<compile_context>
chip_gen: v6e
topology: v6e:2x2x1
jax: 0.10.0
libtpu: 0.0.40
codegen_flags: <defaults>
</compile_context>

<pallas_src>
import math

import jax
import jax.numpy as jnp
from jax.experimental import pallas as pl
from jax.experimental.pallas import tpu as pltpu


# --------------------------- Fused MHA kernel -----------------------------

def _make_fused_kernel(nheads, dk):
    def kernel(q_ref, k_ref, v_ref,
               wq_ref, wk_ref, wv_ref, wo_ref,
               bq_ref, bk_ref, bv_ref, bo_ref,
               o_ref):
        gb, n, d = q_ref.shape
        f32 = jnp.float32

        def proj(x_ref, w_ref, b_ref):
            x = x_ref[...].reshape(gb * n, d)
            y = jnp.dot(x, w_ref[...], preferred_element_type=f32)
            return y + b_ref[...]                      # (gb*n, d), f32

        # Q scale (1/sqrt(dk)) is pre-folded into wq/bq by the wrapper.
        q = proj(q_ref, wq_ref, bq_ref).reshape(gb, n, d)
        k = proj(k_ref, wk_ref, bk_ref).reshape(gb, n, d)
        v = proj(v_ref, wv_ref, bv_ref).reshape(gb, n, d)

        # Per-head attention over the node axis (static unroll over heads).
        head_outs = []
        for h in range(nheads):
            lo = h * dk
            qh = q[:, :, lo:lo + dk]                   # (gb, n, dk)
            kh = k[:, :, lo:lo + dk]
            vh = v[:, :, lo:lo + dk]
            s = jnp.einsum("gnd,gmd->gnm", qh, kh,
                           preferred_element_type=f32)
            s = s - jnp.max(s, axis=-1, keepdims=True)
            p = jnp.exp(s)
            p = p * pl.reciprocal(jnp.sum(p, axis=-1, keepdims=True),
                                  approx=True)
            head_outs.append(
                jnp.einsum("gnm,gmd->gnd", p, vh,
                           preferred_element_type=f32))
        attn = jnp.concatenate(head_outs, axis=-1)     # (gb, n, d)

        out = jnp.dot(attn.reshape(gb * n, d), wo_ref[...],
                      preferred_element_type=f32) + bo_ref[...]
        o_ref[...] = out.reshape(gb, n, d).astype(o_ref.dtype)

    return kernel


def _pick_group_block(num_groups, n_nodes):
    """Groups per grid step: ~512 rows per block, but keep >=2 blocks (v7x megacore)."""
    target = max(1, 512 // max(n_nodes, 1))
    gb = min(num_groups, target)
    if num_groups >= 2:
        gb = min(gb, pl.cdiv(num_groups, 2))
    return max(gb, 1)


# ------------------------------ Full forward ------------------------------

def mha_forward(query, key, value, params, *, nheads):
    """Pallas implementation of MultiHeadedAttention.forward (mask=None, dropout off)."""
    B, T, C, N, D = query.shape
    dk = D // nheads
    (wq, bq), (wk, bk), (wv, bv), (wo, bo) = params

    # Fold the 1/sqrt(dk) attention scale into the query projection (constant fold).
    scale = 1.0 / math.sqrt(dk)
    wq_s = wq * scale
    bq_s = bq * scale

    G = B * T * C
    q = query.reshape(G, N, D)
    k = key.reshape(G, N, D)
    v = value.reshape(G, N, D)

    gb = _pick_group_block(G, N)
    num_blocks = pl.cdiv(G, gb)
    g_pad = num_blocks * gb
    if g_pad != G:
        pad = ((0, g_pad - G), (0, 0), (0, 0))
        q = jnp.pad(q, pad)
        k = jnp.pad(k, pad)
        v = jnp.pad(v, pad)

    grp_spec = pl.BlockSpec((gb, N, D), lambda i: (i, 0, 0))
    w_spec = pl.BlockSpec((D, D), lambda i: (0, 0))
    b_spec = pl.BlockSpec((1, D), lambda i: (0, 0))

    out = pl.pallas_call(
        _make_fused_kernel(nheads, dk),
        out_shape=jax.ShapeDtypeStruct((g_pad, N, D), query.dtype),
        grid_spec=pltpu.PrefetchScalarGridSpec(
            num_scalar_prefetch=0,
            grid=(num_blocks,),
            in_specs=[grp_spec, grp_spec, grp_spec,
                      w_spec, w_spec, w_spec, w_spec,
                      b_spec, b_spec, b_spec, b_spec],
            out_specs=pl.BlockSpec((gb, N, D), lambda i: (i, 0, 0)),
        ),
        compiler_params=pltpu.CompilerParams(
            dimension_semantics=("parallel",)),
    )(q, k, v,
      wq_s, wk, wv, wo,
      bq_s.reshape(1, D), bk.reshape(1, D), bv.reshape(1, D), bo.reshape(1, D))

    return out[:G].reshape(B, T, C, N, D)


# -------------------------- Pure-JAX reference ----------------------------

def mha_reference(query, key, value, params, nheads):
    B, T, C, N, D = query.shape
    dk = D // nheads
    (wq, bq), (wk, bk), (wv, bv), (wo, bo) = params

    def project(x, w, b):
        y = x.reshape(-1, D) @ w + b
        return y.reshape(B, T, C, N, nheads, dk).transpose(0, 4, 1, 2, 3, 5)

    q = project(query, wq, bq)   # (B,H,T,C,N,dk)
    k = project(key, wk, bk)
    v = project(value, wv, bv)
    s = jnp.einsum("bhtcnd,bhtcmd->bhtcnm", q, k) / math.sqrt(dk)
    p = jax.nn.softmax(s, axis=-1)
    x = jnp.einsum("bhtcnm,bhtcmd->bhtcnd", p, v)
    x = x.transpose(0, 2, 3, 4, 1, 5).reshape(B, T, C, N, D)
    return (x.reshape(-1, D) @ wo + bo).reshape(B, T, C, N, D)


# --------------------------------- Main -----------------------------------

if __name__ == "__main__":
    d_model, nheads = 32, 4
    B, T, C, N = 2, 3, 2, 8

    key0 = jax.random.PRNGKey(0)
    keys = jax.random.split(key0, 12)

    # Deterministic parameter init (PyTorch-style uniform +/- 1/sqrt(fan_in)).
    bound = 1.0 / math.sqrt(d_model)
    params = []
    for i in range(4):
        w = jax.random.uniform(keys[i], (d_model, d_model), jnp.float32, -bound, bound)
        b = jax.random.uniform(keys[4 + i], (d_model,), jnp.float32, -bound, bound)
        params.append((w, b))

    query = jax.random.normal(keys[8], (B, T, C, N, d_model), jnp.float32)
    key_in = jax.random.normal(keys[9], (B, T, C, N, d_model), jnp.float32)
    value = jax.random.normal(keys[10], (B, T, C, N, d_model), jnp.float32)

    fwd = jax.jit(mha_forward, static_argnames=("nheads",))
    out = fwd(query, key_in, value, params, nheads=nheads)
    out = jax.block_until_ready(out)

    ref = mha_reference(query, key_in, value, params, nheads)
    assert out.shape == (B, T, C, N, d_model)
    # Tolerance accounts for the approx (EUP) reciprocal in the softmax denominator.
    assert jnp.allclose(out, ref, atol=2e-3, rtol=2e-3), "mismatch vs reference"

    print("KERNEL_OK")
</pallas_src>

<mosaic_0001>
module attributes {stable_mosaic.version = 11 : i64} {
  func.func @kernel(%arg0: i32, %arg1: memref<6x8x32xf32, #tpu.memory_space<vmem>>, %arg2: memref<6x8x32xf32, #tpu.memory_space<vmem>>, %arg3: memref<6x8x32xf32, #tpu.memory_space<vmem>>, %arg4: memref<32x32xf32, #tpu.memory_space<vmem>>, %arg5: memref<32x32xf32, #tpu.memory_space<vmem>>, %arg6: memref<32x32xf32, #tpu.memory_space<vmem>>, %arg7: memref<32x32xf32, #tpu.memory_space<vmem>>, %arg8: memref<1x32xf32, #tpu.memory_space<vmem>>, %arg9: memref<1x32xf32, #tpu.memory_space<vmem>>, %arg10: memref<1x32xf32, #tpu.memory_space<vmem>>, %arg11: memref<1x32xf32, #tpu.memory_space<vmem>>, %arg12: memref<6x8x32xf32, #tpu.memory_space<vmem>>) attributes {dimension_semantics = [#tpu.dimension_semantics<parallel>], iteration_bounds = array<i64: 2>, scalar_prefetch = 0 : i64, scratch_operands = 0 : i64, tpu.core_type = #tpu.core_type<tc>, window_params = [{transform_indices = @transform_0, window_bounds = array<i64: 6, 8, 32>}, {transform_indices = @transform_1, window_bounds = array<i64: 6, 8, 32>}, {transform_indices = @transform_2, window_bounds = array<i64: 6, 8, 32>}, {pipeline_mode = #tpu.pipeline_mode<synchronous>, transform_indices = @transform_3, window_bounds = array<i64: 32, 32>}, {pipeline_mode = #tpu.pipeline_mode<synchronous>, transform_indices = @transform_4, window_bounds = array<i64: 32, 32>}, {pipeline_mode = #tpu.pipeline_mode<synchronous>, transform_indices = @transform_5, window_bounds = array<i64: 32, 32>}, {pipeline_mode = #tpu.pipeline_mode<synchronous>, transform_indices = @transform_6, window_bounds = array<i64: 32, 32>}, {pipeline_mode = #tpu.pipeline_mode<synchronous>, transform_indices = @transform_7, window_bounds = array<i64: 1, 32>}, {pipeline_mode = #tpu.pipeline_mode<synchronous>, transform_indices = @transform_8, window_bounds = array<i64: 1, 32>}, {pipeline_mode = #tpu.pipeline_mode<synchronous>, transform_indices = @transform_9, window_bounds = array<i64: 1, 32>}, {pipeline_mode = #tpu.pipeline_mode<synchronous>, transform_indices = @transform_10, window_bounds = array<i64: 1, 32>}, {transform_indices = @transform_11, window_bounds = array<i64: 6, 8, 32>}]} {
    %c0 = arith.constant 0 : index
    %c0_0 = arith.constant 0 : index
    %c0_1 = arith.constant 0 : index
    %0 = vector.load %arg1[%c0, %c0_0, %c0_1] : memref<6x8x32xf32, #tpu.memory_space<vmem>>, vector<6x8x32xf32>
    %1 = vector.shape_cast %0 : vector<6x8x32xf32> to vector<48x32xf32>
    %c0_2 = arith.constant 0 : index
    %c0_3 = arith.constant 0 : index
    %2 = vector.load %arg4[%c0_2, %c0_3] : memref<32x32xf32, #tpu.memory_space<vmem>>, vector<32x32xf32>
    %cst = arith.constant dense<0.000000e+00> : vector<48x32xf32>
    %3 = tpu.matmul %1, %2, %cst {dimension_numbers = #tpu.dot_dimension_numbers<[1], [0], [0], [1], [0, 0, 1, 1], [], []>} : vector<48x32xf32>, vector<32x32xf32>, vector<48x32xf32> -> vector<48x32xf32>
    %c0_4 = arith.constant 0 : index
    %c0_5 = arith.constant 0 : index
    %4 = vector.load %arg8[%c0_4, %c0_5] : memref<1x32xf32, #tpu.memory_space<vmem>>, vector<1x32xf32>
    %5 = vector.broadcast %4 : vector<1x32xf32> to vector<48x32xf32>
    %6 = arith.addf %3, %5 : vector<48x32xf32>
    %7 = vector.shape_cast %6 : vector<48x32xf32> to vector<6x8x32xf32>
    %c0_6 = arith.constant 0 : index
    %c0_7 = arith.constant 0 : index
    %c0_8 = arith.constant 0 : index
    %8 = vector.load %arg2[%c0_6, %c0_7, %c0_8] : memref<6x8x32xf32, #tpu.memory_space<vmem>>, vector<6x8x32xf32>
    %9 = vector.shape_cast %8 : vector<6x8x32xf32> to vector<48x32xf32>
    %c0_9 = arith.constant 0 : index
    %c0_10 = arith.constant 0 : index
    %10 = vector.load %arg5[%c0_9, %c0_10] : memref<32x32xf32, #tpu.memory_space<vmem>>, vector<32x32xf32>
    %cst_11 = arith.constant dense<0.000000e+00> : vector<48x32xf32>
    %11 = tpu.matmul %9, %10, %cst_11 {dimension_numbers = #tpu.dot_dimension_numbers<[1], [0], [0], [1], [0, 0, 1, 1], [], []>} : vector<48x32xf32>, vector<32x32xf32>, vector<48x32xf32> -> vector<48x32xf32>
    %c0_12 = arith.constant 0 : index
    %c0_13 = arith.constant 0 : index
    %12 = vector.load %arg9[%c0_12, %c0_13] : memref<1x32xf32, #tpu.memory_space<vmem>>, vector<1x32xf32>
    %13 = vector.broadcast %12 : vector<1x32xf32> to vector<48x32xf32>
    %14 = arith.addf %11, %13 : vector<48x32xf32>
    %15 = vector.shape_cast %14 : vector<48x32xf32> to vector<6x8x32xf32>
    %c0_14 = arith.constant 0 : index
    %c0_15 = arith.constant 0 : index
    %c0_16 = arith.constant 0 : index
    %16 = vector.load %arg3[%c0_14, %c0_15, %c0_16] : memref<6x8x32xf32, #tpu.memory_space<vmem>>, vector<6x8x32xf32>
    %17 = vector.shape_cast %16 : vector<6x8x32xf32> to vector<48x32xf32>
    %c0_17 = arith.constant 0 : index
    %c0_18 = arith.constant 0 : index
    %18 = vector.load %arg6[%c0_17, %c0_18] : memref<32x32xf32, #tpu.memory_space<vmem>>, vector<32x32xf32>
    %cst_19 = arith.constant dense<0.000000e+00> : vector<48x32xf32>
    %19 = tpu.matmul %17, %18, %cst_19 {dimension_numbers = #tpu.dot_dimension_numbers<[1], [0], [0], [1], [0, 0, 1, 1], [], []>} : vector<48x32xf32>, vector<32x32xf32>, vector<48x32xf32> -> vector<48x32xf32>
    %c0_20 = arith.constant 0 : index
    %c0_21 = arith.constant 0 : index
    %20 = vector.load %arg10[%c0_20, %c0_21] : memref<1x32xf32, #tpu.memory_space<vmem>>, vector<1x32xf32>
    %21 = vector.broadcast %20 : vector<1x32xf32> to vector<48x32xf32>
    %22 = arith.addf %19, %21 : vector<48x32xf32>
    %23 = vector.shape_cast %22 : vector<48x32xf32> to vector<6x8x32xf32>
    %24 = vector.extract_strided_slice %7 {offsets = [0, 0, 0], sizes = [6, 8, 8], strides = [1, 1, 1]} : vector<6x8x32xf32> to vector<6x8x8xf32>
    %25 = vector.extract_strided_slice %15 {offsets = [0, 0, 0], sizes = [6, 8, 8], strides = [1, 1, 1]} : vector<6x8x32xf32> to vector<6x8x8xf32>
    %26 = vector.extract_strided_slice %23 {offsets = [0, 0, 0], sizes = [6, 8, 8], strides = [1, 1, 1]} : vector<6x8x32xf32> to vector<6x8x8xf32>
    "tpu.trace_start"() <{level = 10 : i32, message = "gnd,gmd->gnm"}> : () -> ()
    %cst_22 = arith.constant dense<0.000000e+00> : vector<6x8x8xf32>
    %27 = tpu.matmul %24, %25, %cst_22 {dimension_numbers = #tpu.dot_dimension_numbers<[2], [2], [1], [1], [0, 0, 0, 1, 1, 1], [0], [0]>} : vector<6x8x8xf32>, vector<6x8x8xf32>, vector<6x8x8xf32> -> vector<6x8x8xf32>
    "tpu.trace_stop"() : () -> ()
    %cst_23 = arith.constant dense<0xFF800000> : vector<6x8xf32>
    %28 = vector.multi_reduction <maximumf>, %27, %cst_23 [2] : vector<6x8x8xf32> to vector<6x8xf32>
    %29 = vector.shape_cast %28 : vector<6x8xf32> to vector<6x8x1xf32>
    %30 = vector.broadcast %29 : vector<6x8x1xf32> to vector<6x8x8xf32>
    %31 = arith.subf %27, %30 : vector<6x8x8xf32>
    %32 = math.exp %31 : vector<6x8x8xf32>
    %cst_24 = arith.constant dense<0.000000e+00> : vector<6x8xf32>
    %33 = vector.multi_reduction <add>, %32, %cst_24 [2] : vector<6x8x8xf32> to vector<6x8xf32>
    %34 = vector.shape_cast %33 : vector<6x8xf32> to vector<6x8x1xf32>
    %35 = tpu.reciprocal %34 {approx = true} : vector<6x8x1xf32> -> vector<6x8x1xf32>
    %36 = vector.broadcast %35 : vector<6x8x1xf32> to vector<6x8x8xf32>
    %37 = arith.mulf %32, %36 : vector<6x8x8xf32>
    "tpu.trace_start"() <{level = 10 : i32, message = "gnm,gmd->gnd"}> : () -> ()
    %cst_25 = arith.constant dense<0.000000e+00> : vector<6x8x8xf32>
    %38 = tpu.matmul %37, %26, %cst_25 {dimension_numbers = #tpu.dot_dimension_numbers<[2], [1], [1], [2], [0, 0, 0, 1, 1, 2], [0], [0]>} : vector<6x8x8xf32>, vector<6x8x8xf32>, vector<6x8x8xf32> -> vector<6x8x8xf32>
    "tpu.trace_stop"() : () -> ()
    %39 = vector.extract_strided_slice %7 {offsets = [0, 0, 8], sizes = [6, 8, 8], strides = [1, 1, 1]} : vector<6x8x32xf32> to vector<6x8x8xf32>
    %40 = vector.extract_strided_slice %15 {offsets = [0, 0, 8], sizes = [6, 8, 8], strides = [1, 1, 1]} : vector<6x8x32xf32> to vector<6x8x8xf32>
    %41 = vector.extract_strided_slice %23 {offsets = [0, 0, 8], sizes = [6, 8, 8], strides = [1, 1, 1]} : vector<6x8x32xf32> to vector<6x8x8xf32>
    "tpu.trace_start"() <{level = 10 : i32, message = "gnd,gmd->gnm"}> : () -> ()
    %cst_26 = arith.constant dense<0.000000e+00> : vector<6x8x8xf32>
    %42 = tpu.matmul %39, %40, %cst_26 {dimension_numbers = #tpu.dot_dimension_numbers<[2], [2], [1], [1], [0, 0, 0, 1, 1, 1], [0], [0]>} : vector<6x8x8xf32>, vector<6x8x8xf32>, vector<6x8x8xf32> -> vector<6x8x8xf32>
    "tpu.trace_stop"() : () -> ()
    %cst_27 = arith.constant dense<0xFF800000> : vector<6x8xf32>
    %43 = vector.multi_reduction <maximumf>, %42, %cst_27 [2] : vector<6x8x8xf32> to vector<6x8xf32>
    %44 = vector.shape_cast %43 : vector<6x8xf32> to vector<6x8x1xf32>
    %45 = vector.broadcast %44 : vector<6x8x1xf32> to vector<6x8x8xf32>
    %46 = arith.subf %42, %45 : vector<6x8x8xf32>
    %47 = math.exp %46 : vector<6x8x8xf32>
    %cst_28 = arith.constant dense<0.000000e+00> : vector<6x8xf32>
    %48 = vector.multi_reduction <add>, %47, %cst_28 [2] : vector<6x8x8xf32> to vector<6x8xf32>
    %49 = vector.shape_cast %48 : vector<6x8xf32> to vector<6x8x1xf32>
    %50 = tpu.reciprocal %49 {approx = true} : vector<6x8x1xf32> -> vector<6x8x1xf32>
    %51 = vector.broadcast %50 : vector<6x8x1xf32> to vector<6x8x8xf32>
    %52 = arith.mulf %47, %51 : vector<6x8x8xf32>
    "tpu.trace_start"() <{level = 10 : i32, message = "gnm,gmd->gnd"}> : () -> ()
    %cst_29 = arith.constant dense<0.000000e+00> : vector<6x8x8xf32>
    %53 = tpu.matmul %52, %41, %cst_29 {dimension_numbers = #tpu.dot_dimension_numbers<[2], [1], [1], [2], [0, 0, 0, 1, 1, 2], [0], [0]>} : vector<6x8x8xf32>, vector<6x8x8xf32>, vector<6x8x8xf32> -> vector<6x8x8xf32>
    "tpu.trace_stop"() : () -> ()
    %54 = vector.extract_strided_slice %7 {offsets = [0, 0, 16], sizes = [6, 8, 8], strides = [1, 1, 1]} : vector<6x8x32xf32> to vector<6x8x8xf32>
    %55 = vector.extract_strided_slice %15 {offsets = [0, 0, 16], sizes = [6, 8, 8], strides = [1, 1, 1]} : vector<6x8x32xf32> to vector<6x8x8xf32>
    %56 = vector.extract_strided_slice %23 {offsets = [0, 0, 16], sizes = [6, 8, 8], strides = [1, 1, 1]} : vector<6x8x32xf32> to vector<6x8x8xf32>
    "tpu.trace_start"() <{level = 10 : i32, message = "gnd,gmd->gnm"}> : () -> ()
    %cst_30 = arith.constant dense<0.000000e+00> : vector<6x8x8xf32>
    %57 = tpu.matmul %54, %55, %cst_30 {dimension_numbers = #tpu.dot_dimension_numbers<[2], [2], [1], [1], [0, 0, 0, 1, 1, 1], [0], [0]>} : vector<6x8x8xf32>, vector<6x8x8xf32>, vector<6x8x8xf32> -> vector<6x8x8xf32>
    "tpu.trace_stop"() : () -> ()
    %cst_31 = arith.constant dense<0xFF800000> : vector<6x8xf32>
    %58 = vector.multi_reduction <maximumf>, %57, %cst_31 [2] : vector<6x8x8xf32> to vector<6x8xf32>
    %59 = vector.shape_cast %58 : vector<6x8xf32> to vector<6x8x1xf32>
    %60 = vector.broadcast %59 : vector<6x8x1xf32> to vector<6x8x8xf32>
    %61 = arith.subf %57, %60 : vector<6x8x8xf32>
    %62 = math.exp %61 : vector<6x8x8xf32>
    %cst_32 = arith.constant dense<0.000000e+00> : vector<6x8xf32>
    %63 = vector.multi_reduction <add>, %62, %cst_32 [2] : vector<6x8x8xf32> to vector<6x8xf32>
    %64 = vector.shape_cast %63 : vector<6x8xf32> to vector<6x8x1xf32>
    %65 = tpu.reciprocal %64 {approx = true} : vector<6x8x1xf32> -> vector<6x8x1xf32>
    %66 = vector.broadcast %65 : vector<6x8x1xf32> to vector<6x8x8xf32>
    %67 = arith.mulf %62, %66 : vector<6x8x8xf32>
    "tpu.trace_start"() <{level = 10 : i32, message = "gnm,gmd->gnd"}> : () -> ()
    %cst_33 = arith.constant dense<0.000000e+00> : vector<6x8x8xf32>
    %68 = tpu.matmul %67, %56, %cst_33 {dimension_numbers = #tpu.dot_dimension_numbers<[2], [1], [1], [2], [0, 0, 0, 1, 1, 2], [0], [0]>} : vector<6x8x8xf32>, vector<6x8x8xf32>, vector<6x8x8xf32> -> vector<6x8x8xf32>
    "tpu.trace_stop"() : () -> ()
    %69 = vector.extract_strided_slice %7 {offsets = [0, 0, 24], sizes = [6, 8, 8], strides = [1, 1, 1]} : vector<6x8x32xf32> to vector<6x8x8xf32>
    %70 = vector.extract_strided_slice %15 {offsets = [0, 0, 24], sizes = [6, 8, 8], strides = [1, 1, 1]} : vector<6x8x32xf32> to vector<6x8x8xf32>
    %71 = vector.extract_strided_slice %23 {offsets = [0, 0, 24], sizes = [6, 8, 8], strides = [1, 1, 1]} : vector<6x8x32xf32> to vector<6x8x8xf32>
    "tpu.trace_start"() <{level = 10 : i32, message = "gnd,gmd->gnm"}> : () -> ()
    %cst_34 = arith.constant dense<0.000000e+00> : vector<6x8x8xf32>
    %72 = tpu.matmul %69, %70, %cst_34 {dimension_numbers = #tpu.dot_dimension_numbers<[2], [2], [1], [1], [0, 0, 0, 1, 1, 1], [0], [0]>} : vector<6x8x8xf32>, vector<6x8x8xf32>, vector<6x8x8xf32> -> vector<6x8x8xf32>
    "tpu.trace_stop"() : () -> ()
    %cst_35 = arith.constant dense<0xFF800000> : vector<6x8xf32>
    %73 = vector.multi_reduction <maximumf>, %72, %cst_35 [2] : vector<6x8x8xf32> to vector<6x8xf32>
    %74 = vector.shape_cast %73 : vector<6x8xf32> to vector<6x8x1xf32>
    %75 = vector.broadcast %74 : vector<6x8x1xf32> to vector<6x8x8xf32>
    %76 = arith.subf %72, %75 : vector<6x8x8xf32>
    %77 = math.exp %76 : vector<6x8x8xf32>
    %cst_36 = arith.constant dense<0.000000e+00> : vector<6x8xf32>
    %78 = vector.multi_reduction <add>, %77, %cst_36 [2] : vector<6x8x8xf32> to vector<6x8xf32>
    %79 = vector.shape_cast %78 : vector<6x8xf32> to vector<6x8x1xf32>
    %80 = tpu.reciprocal %79 {approx = true} : vector<6x8x1xf32> -> vector<6x8x1xf32>
    %81 = vector.broadcast %80 : vector<6x8x1xf32> to vector<6x8x8xf32>
    %82 = arith.mulf %77, %81 : vector<6x8x8xf32>
    "tpu.trace_start"() <{level = 10 : i32, message = "gnm,gmd->gnd"}> : () -> ()
    %cst_37 = arith.constant dense<0.000000e+00> : vector<6x8x8xf32>
    %83 = tpu.matmul %82, %71, %cst_37 {dimension_numbers = #tpu.dot_dimension_numbers<[2], [1], [1], [2], [0, 0, 0, 1, 1, 2], [0], [0]>} : vector<6x8x8xf32>, vector<6x8x8xf32>, vector<6x8x8xf32> -> vector<6x8x8xf32>
    "tpu.trace_stop"() : () -> ()
    %84 = tpu.concatenate %38, %53, %68, %83 in 2 : vector<6x8x8xf32>, vector<6x8x8xf32>, vector<6x8x8xf32>, vector<6x8x8xf32> -> vector<6x8x32xf32>
    %85 = vector.shape_cast %84 : vector<6x8x32xf32> to vector<48x32xf32>
    %c0_38 = arith.constant 0 : index
    %c0_39 = arith.constant 0 : index
    %86 = vector.load %arg7[%c0_38, %c0_39] : memref<32x32xf32, #tpu.memory_space<vmem>>, vector<32x32xf32>
    %cst_40 = arith.constant dense<0.000000e+00> : vector<48x32xf32>
    %87 = tpu.matmul %85, %86, %cst_40 {dimension_numbers = #tpu.dot_dimension_numbers<[1], [0], [0], [1], [0, 0, 1, 1], [], []>} : vector<48x32xf32>, vector<32x32xf32>, vector<48x32xf32> -> vector<48x32xf32>
    %c0_41 = arith.constant 0 : index
    %c0_42 = arith.constant 0 : index
    %88 = vector.load %arg11[%c0_41, %c0_42] : memref<1x32xf32, #tpu.memory_space<vmem>>, vector<1x32xf32>
    %89 = vector.broadcast %88 : vector<1x32xf32> to vector<48x32xf32>
    %90 = arith.addf %87, %89 : vector<48x32xf32>
    %91 = vector.shape_cast %90 : vector<48x32xf32> to vector<6x8x32xf32>
    %c0_43 = arith.constant 0 : index
    %c0_44 = arith.constant 0 : index
    %c0_45 = arith.constant 0 : index
    %92 = vector.load %arg12[%c0_43, %c0_44, %c0_45] : memref<6x8x32xf32, #tpu.memory_space<vmem>>, vector<6x8x32xf32>
    tpu.vector_store %arg12[%c0_43, %c0_44, %c0_45], %91 {strides = array<i32>} : memref<6x8x32xf32, #tpu.memory_space<vmem>>, vector<6x8x32xf32>,
    return
  }
  func.func @transform_0(%arg0: i32) -> (i32, i32, i32) {
    %c0_i32 = arith.constant 0 : i32
    %c0_i32_0 = arith.constant 0 : i32
    %c0_i32_1 = arith.constant 0 : i32
    return %arg0, %c0_i32, %c0_i32_0 : i32, i32, i32
  }
  func.func @transform_1(%arg0: i32) -> (i32, i32, i32) {
    %c0_i32 = arith.constant 0 : i32
    %c0_i32_0 = arith.constant 0 : i32
    %c0_i32_1 = arith.constant 0 : i32
    return %arg0, %c0_i32, %c0_i32_0 : i32, i32, i32
  }
  func.func @transform_2(%arg0: i32) -> (i32, i32, i32) {
    %c0_i32 = arith.constant 0 : i32
    %c0_i32_0 = arith.constant 0 : i32
    %c0_i32_1 = arith.constant 0 : i32
    return %arg0, %c0_i32, %c0_i32_0 : i32, i32, i32
  }
  func.func @transform_3(%arg0: i32) -> (i32, i32) {
    %c0_i32 = arith.constant 0 : i32
    %c0_i32_0 = arith.constant 0 : i32
    %c0_i32_1 = arith.constant 0 : i32
    return %c0_i32, %c0_i32_0 : i32, i32
  }
  func.func @transform_4(%arg0: i32) -> (i32, i32) {
    %c0_i32 = arith.constant 0 : i32
    %c0_i32_0 = arith.constant 0 : i32
    %c0_i32_1 = arith.constant 0 : i32
    return %c0_i32, %c0_i32_0 : i32, i32
  }
  func.func @transform_5(%arg0: i32) -> (i32, i32) {
    %c0_i32 = arith.constant 0 : i32
    %c0_i32_0 = arith.constant 0 : i32
    %c0_i32_1 = arith.constant 0 : i32
    return %c0_i32, %c0_i32_0 : i32, i32
  }
  func.func @transform_6(%arg0: i32) -> (i32, i32) {
    %c0_i32 = arith.constant 0 : i32
    %c0_i32_0 = arith.constant 0 : i32
    %c0_i32_1 = arith.constant 0 : i32
    return %c0_i32, %c0_i32_0 : i32, i32
  }
  func.func @transform_7(%arg0: i32) -> (i32, i32) {
    %c0_i32 = arith.constant 0 : i32
    %c0_i32_0 = arith.constant 0 : i32
    %c0_i32_1 = arith.constant 0 : i32
    return %c0_i32, %c0_i32_0 : i32, i32
  }
  func.func @transform_8(%arg0: i32) -> (i32, i32) {
    %c0_i32 = arith.constant 0 : i32
    %c0_i32_0 = arith.constant 0 : i32
    %c0_i32_1 = arith.constant 0 : i32
    return %c0_i32, %c0_i32_0 : i32, i32
  }
  func.func @transform_9(%arg0: i32) -> (i32, i32) {
    %c0_i32 = arith.constant 0 : i32
    %c0_i32_0 = arith.constant 0 : i32
    %c0_i32_1 = arith.constant 0 : i32
    return %c0_i32, %c0_i32_0 : i32, i32
  }
  func.func @transform_10(%arg0: i32) -> (i32, i32) {
    %c0_i32 = arith.constant 0 : i32
    %c0_i32_0 = arith.constant 0 : i32
    %c0_i32_1 = arith.constant 0 : i32
    return %c0_i32, %c0_i32_0 : i32, i32
  }
  func.func @transform_11(%arg0: i32) -> (i32, i32, i32) {
    %c0_i32 = arith.constant 0 : i32
    %c0_i32_0 = arith.constant 0 : i32
    %c0_i32_1 = arith.constant 0 : i32
    return %arg0, %c0_i32, %c0_i32_0 : i32, i32, i32
  }
}

</mosaic_0001>

<bundles_post_ra>
// kernel: mha_forward.1
= control target key start
LH: loop header
LB: loop body
LE: loop exit
PB: predicated region body
PF: predicated region fallthrough
CT: control target
= control target key end

     0   :  { %s7153_s0 = inlined_call_operand.hbm [shape: f32[12,8,32], index: 0, kind: input, shape index: {}]   ;;  %s7154_s1 = inlined_call_operand.hbm [shape: f32[12,8,32], index: 1, kind: input, shape index: {}]   ;;  %s7155_s2 = inlined_call_operand.hbm [shape: f32[12,8,32], index: 2, kind: input, shape index: {}]   ;;  %s7156_s3 = inlined_call_operand.vmem [shape: f32[32,32], index: 3, kind: input, shape index: {}]   ;;  %s7157_s4 = inlined_call_operand.vmem [shape: f32[32,32], index: 4, kind: input, shape index: {}]   ;;  %s7158_s5 = inlined_call_operand.vmem [shape: f32[32,32], index: 5, kind: input, shape index: {}]   ;;  %s7159_s6 = inlined_call_operand.hbm [shape: f32[32,32], index: 6, kind: input, shape index: {}]   ;;  %s7160_s7 = inlined_call_operand.vmem [shape: f32[1,32], index: 7, kind: input, shape index: {}]   ;;  %s7161_s8 = inlined_call_operand.vmem [shape: f32[1,32], index: 8, kind: input, shape index: {}]   ;;  %s7162_s9 = inlined_call_operand.vmem [shape: f32[1,32], index: 9, kind: input, shape index: {}]   ;;  %s7163_s10 = inlined_call_operand.vmem [shape: f32[1,32], index: 10, kind: input, shape index: {}]   ;;  %s7164_s11 = inlined_call_operand.hbm [shape: f32[12,8,32], index: 11, kind: output, shape index: {}]  }
   0x1   :  { %7185 = sst [smem:[#allocation22_spill]] %s7154_s1 }
   0x2   :  { %7186 = sst [smem:[#allocation23_spill]] %s7163_s10 }
   0x3   :  { %7187 = sst [smem:[#allocation24_spill]] %s7164_s11 }
   0x4   :  { %16 = vsyncpa [#allocation3], 0 }
   0x5   :  { %18 = vsyncpa [#allocation3 + $0x1], 0 }
   0x6   :  { %19 = vsyncpa [#allocation6], 0 }
   0x7   :  { %21 = vsyncpa [#allocation6 + $0x1], 0 }
   0x8   :  { %22 = vsyncpa [#allocation9], 0 }
   0x9   :  { %23 = vsyncpa [#allocation4], 0 }
   0xa   :  { %25 = vsyncpa [#allocation4 + $0x1], 0  ;;  %s6197_s17 = smov 0   ;;  %s6199_s18 = smov 0  }
   0xb   :  { %s6201_s19 = smov 0   ;;  %s6203_s20 = smov 0  }
   0xc LB: > { %7188 = sst [smem:[#allocation15_spill]] %s6107_s17  ;;  %s6218_s21 = sadd.s32 1, %s6119_s20   ;;  %s6119_s20 = sphi %s6203_s20, %s7221_s20   ;;  %s6115_s19 = sphi %s6201_s19, %s7223_s19   ;;  %s6111_s18 = sphi %s6199_s18, %s7225_s18   ;;  %s6107_s17 = sphi %s6197_s17, %s7224_s17  }
   0xd   : > { %7189 = sst [smem:[#allocation16_spill]] %s6115_s19  ;;  %s38_s22 = sadd.s32 1, %s6115_s19 }
   0xe   : > { %7190 = sst [smem:[#allocation17_spill]] %s6119_s20  ;;  %s35_s23 = ssub.s32 %s6119_s20, %s6218_s21 }
   0xf   : > { %7191 = sst [smem:[#allocation18_spill]] %s6218_s21  ;;  %p7168_p0 = scmp.ne.s32.totalorder %s6115_s19, %s6111_s18 }
  0x10   : > { %p36_p1 = scmp.eq.s32.totalorder %s35_s23, 0  ;;  %p46_p2 = scmp.eq.s32.totalorder %s6119_s20, 0 }
  0x11   : > { %p5794_p5 = scmp.lt.s32.totalorder %s6119_s20, 2  ;;  %s7165_s25 = sand.u32 1, %s6115_s19  }
  0x12   : > { %s6227_s24 = scalar_select %p36_p1, %s6115_s19, %s38_s22  }
  0x13   : > { %p47_p3 = por %p46_p2, %p7168_p0  ;;  %s6237_s26 = smul.u32 48, %s7165_s25 }
  0x14   : > { %7192 = sst [smem:[#allocation19_spill]] %s6227_s24  ;;  %s376_s27 = sand.u32 1, %s6119_s20  }
  0x15   : > { %s6241_s28 = smul.u32 768, %s6119_s20  ;;  %p6243_p6 = pnand %p5794_p5, %p47_p3 }
  0x16   : > { %s7194_s1 = sld [smem:[#allocation22_spill]]  ;;  %s380_s14 = scalar_lea.vmem [#allocation5], %s6237_s26 }
  0x17   : > { %s387_s15 = sshll.u32 %s380_s14, 4  ;;  %s6256_s16 = scalar_lea.sflag [#allocation6], %s376_s27  ;;  %s6254_s15 = int_to_ptr.vmem [resolvable:$true] %s387_s15 }
  0x18   : > { %p6262_p8 = pneg %p6243_p6 }
  0x1c   : > { %s6251_s13 = scalar_lea.hbm %s7194_s1, %s6241_s28  ;;  %s5942_s25 = scalar_lea.hbm %s7194_s1, 1536 }
  0x1d   : > { %s5937_s22 = scalar_lea.hbm %s6251_s13, 768  ;;  %p5943_p11 = scmp.lt.s32.totalorder %s6251_s13, %s7194_s1 }
  0x1e   : > { %p5938_p7 = scmp.ne.s32.totalorder %s6251_s13, %s5937_s22  ;;  %p5944_p12 = scmp.lt.s32.totalorder %s5942_s25, %s5937_s22 }
  0x20   : > { %p5940_p9 = pnand %p6262_p8, %p5938_p7  ;;  %p5945_p13 = por %p5944_p12, %p5943_p11 }
  0x22   : > { %p5941_p10 = pneg %p5940_p9 }
  0x24   : > { %p5946_p1 = pnand %p5945_p13, %p5941_p10 }
  0x26   : > { %5949 = shalt.err (!%p5946_p1)
}
  0x27   : > { %s5950_s27 = scalar_lea.vmem %s6254_s15, 768  ;;  %s6121_s21 = smov [#allocation5]  }
  0x28   : > { %p5951_p2 = scmp.ne.s32.totalorder %s6254_s15, %s5950_s27  ;;  %s5955_s30 = sshll.u32 %s6121_s21, 4  ;;  %s5956_s30 = int_to_ptr.vmem [resolvable:$false] %s5955_s30 }
  0x29   : > { %s5957_s12 = scalar_lea.vmem %s5956_s30, 1536  ;;  %p5958_p7 = scmp.lt.s32.totalorder %s6254_s15, %s5956_s30 }
  0x2a   : > { %p5953_p3 = pnand %p5951_p2, %p6262_p8  ;;  %p5959_p9 = scmp.lt.s32.totalorder %s5957_s12, %s5950_s27 }
  0x2c   : > { %p5954_p5 = pneg %p5953_p3  ;;  %p5960_p4 = por %p5959_p9, %p5958_p7 }
  0x2e   : > { %p5961_p0 = pnand %p5960_p4, %p5954_p5 }
  0x30   : > { %5964 = shalt.err (!%p5961_p0)
}
  0x31   : > { %s7169_s24 = smov 128   ;;  %s7171_s21 = smov 8  }
  0x32   : > { %5785 = dma.hbm_to_vmem [thread:$0]  (!%p6243_p6), %s6251_s13, 768, %s6254_s15, %s6256_s16, %s7169_s24, %s7169_s24, %s7171_s21  }
  0x33   : > { %s6289_s25 = sadd.s32 4294967295, %s6119_s20   ;;  %s5191_s22 = sadd.s32 4294967294, %s6119_s20  }
  0x34   : > { %p51_p0 = scmp.ne.s32.totalorder %s6111_s18, %s6107_s17  ;;  %p7179_p4 = scmp.eq.s32.totalorder %s6289_s25, 0 }
  0x35   : > { %p295_p10 = scmp.eq.s32.totalorder %s6289_s25, 1  ;;  %p301_p11 = scmp.eq.s32.totalorder %s5191_s22, 1 }
  0x36   : > { %p6298_p12 = por %p7179_p4, %p51_p0  ;;  %p5192_p13 = scmp.ge.s32.totalorder %s6119_s20, 1 }
  0x37   : > { %p7197_p1 = scmp.ne.s32.totalorder %s6115_s19, %s6111_s18  ;;  %p6310_p3 = por %p301_p11, %p51_p0 }
  0x38   : > { %s7196_s14 = scalar_select %p6298_p12, 1, 0 }
  0x39   : > { %p6306_p2 = por %p295_p10, %p7197_p1  ;;  %p308_p5 = scmp.lt.s32.totalorder %s6119_s20, 3 }
  0x3a   : > { %s7200_s15 = scalar_select %p6310_p3, 1, 0 }
  0x3b   : > { %s7198_s13 = scalar_select %p6306_p2, 1, 0 }
  0x3c   : > { %7201 = sst [smem:[#allocation21_spill]] %s7200_s15  ;;  %p6315_p7 = pnand %p5192_p13, %p308_p5 }
  0x3d   : > { %7199 = sst [smem:[#allocation20_spill]] %s7198_s13  ;;  %s6124_s30 = smov [#allocation8]  }
  0x3e   : > { %s7202_s27 = scalar_select %p6315_p7, 1, 0 }
  0x3f   : > { %s329_s12 = sshll.u32 %s6124_s30, 4  ;;  %p5775_p9 = pneg %p6315_p7  ;;  %s6319_s12 = int_to_ptr.vmem [resolvable:$true] %s329_s12 }
  0x40   : > { %s6327_s21 = scalar_lea.hbm %s7153_s0, %s6241_s28  ;;  %s359_s1 = scalar_lea.vmem [#allocation2], %s6237_s26 }
  0x41   : > { %s366_s20 = sshll.u32 %s359_s1, 4  ;;  %p6332_p0 = pnand %p5775_p9, %p7179_p4  ;;  %s6336_s20 = int_to_ptr.vmem [resolvable:$true] %s366_s20 }
  0x42   : > { %s7204_s30 = sand.u32 1, %s6115_s19   ;;  %s5965_s11 = scalar_lea.hbm %s6327_s21, 768 }
  0x43   : > { %s7203_s15 = scalar_select %p6332_p0, 1, 0 }
  0x44   : > { %s356_s17 = scalar_lea.sflag [#allocation3], %s7204_s30  ;;  %p5966_p10 = scmp.ne.s32.totalorder %s6327_s21, %s5965_s11 }
  0x45   : > { %s5970_s13 = scalar_lea.hbm %s7153_s0, 1536  ;;  %p5971_p1 = scmp.lt.s32.totalorder %s6327_s21, %s7153_s0 }
  0x46   : > { %p5968_p11 = pnand %p5966_p10, %p6262_p8  ;;  %p5972_p5 = scmp.lt.s32.totalorder %s5970_s13, %s5965_s11 }
  0x48   : > { %p5969_p13 = pneg %p5968_p11  ;;  %p5973_p9 = por %p5972_p5, %p5971_p1 }
  0x4a   : > { %p5974_p4 = pnand %p5973_p9, %p5969_p13 }
  0x4c   : > { %5977 = shalt.err (!%p5974_p4)
}
  0x4d   : > { %s5978_s30 = scalar_lea.vmem %s6336_s20, 768  ;;  %s6125_s19 = smov [#allocation2]  }
  0x4e   : > { %p5979_p3 = scmp.ne.s32.totalorder %s6336_s20, %s5978_s30  ;;  %s5983_s24 = sshll.u32 %s6125_s19, 4  ;;  %s5984_s24 = int_to_ptr.vmem [resolvable:$false] %s5983_s24 }
  0x4f   : > { %s5985_s22 = scalar_lea.vmem %s5984_s24, 1536  ;;  %p5986_p2 = scmp.lt.s32.totalorder %s6336_s20, %s5984_s24 }
  0x50   : > { %p5981_p10 = pnand %p5979_p3, %p6262_p8  ;;  %p5987_p12 = scmp.lt.s32.totalorder %s5985_s22, %s5978_s30 }
  0x52   : > { %p5982_p11 = pneg %p5981_p10  ;;  %p5988_p7 = por %p5987_p12, %p5986_p2 }
  0x54   : > { %p5989_p0 = pnand %p5988_p7, %p5982_p11 }
  0x56   : > { %5992 = shalt.err (!%p5989_p0)
}
  0x57   : > { %s7205_s10 = smov 8   ;;  %s7206_s11 = smov 128  }
  0x58   : > { %5782 = dma.hbm_to_vmem [thread:$0]  (!%p6243_p6), %s6327_s21, 768, %s6336_s20, %s356_s17, %s7206_s11, %s7206_s11, %s7205_s10  }
  0x59   : > { %s6367_s1 = scalar_lea.hbm %s7155_s2, %s6241_s28  ;;  %p7207_p4 = scmp.ne.s32.totalorder %s7203_s15, 0 }
  0x5a   : > { %s6004_s30 = scalar_lea.vmem %s6319_s12, 512  ;;  %p6012_p0 = scmp.lt.s32.totalorder %s6319_s12, %s6319_s12 }
  0x5b   : > { %p5995_p12 = pneg %p7207_p4  ;;  %p6005_p2 = scmp.ne.s32.totalorder %s6319_s12, %s6004_s30 }
  0x5c   : > { %p6013_p13 = scmp.lt.s32.totalorder %s6004_s30, %s6004_s30 }
  0x5d   : > { %p6007_p3 = pnand %p6005_p2, %p5995_p12 }
  0x5e   : > { %p6014_p1 = por %p6013_p13, %p6012_p0 }
  0x5f   : > { %p6008_p7 = pneg %p6007_p3 }
  0x61   : > { %p6015_p5 = pnand %p6014_p1, %p6008_p7 }
  0x63   : > { %6018 = shalt.err (!%p6015_p5)
}
  0x64   : > { %5778 = dma.hbm_to_vmem [thread:$0]  (!%p7207_p4), %s7159_s6, 512, %s6319_s12, [#allocation9], %s7206_s11, %s7206_s11, %s7205_s10  }
  0x65   : > { %s401_s28 = scalar_lea.vmem [#allocation7], %s6237_s26  ;;  %s6019_s24 = scalar_lea.hbm %s6367_s1, 768 }
  0x66   : > { %s408_s21 = sshll.u32 %s401_s28, 4  ;;  %p6020_p9 = scmp.ne.s32.totalorder %s6367_s1, %s6019_s24  ;;  %s409_s21 = int_to_ptr.vmem [resolvable:$true] %s408_s21 }
  0x67   : > { %s6024_s19 = scalar_lea.hbm %s7155_s2, 1536  ;;  %p6025_p12 = scmp.lt.s32.totalorder %s6367_s1, %s7155_s2 }
  0x68   : > { %p6022_p10 = pnand %p6020_p9, %p6262_p8  ;;  %p6026_p2 = scmp.lt.s32.totalorder %s6024_s19, %s6019_s24 }
  0x6a   : > { %p6023_p11 = pneg %p6022_p10  ;;  %p6027_p3 = por %p6026_p2, %p6025_p12 }
  0x6c   : > { %p6028_p7 = pnand %p6027_p3, %p6023_p11 }
  0x6e   : > { %6031 = shalt.err (!%p6028_p7)
}
  0x6f   : > { %s6032_s26 = scalar_lea.vmem %s409_s21, 768  ;;  %s6126_s12 = smov [#allocation7]  }
  0x70   : > { %p6033_p4 = scmp.ne.s32.totalorder %s409_s21, %s6032_s26  ;;  %s6037_s17 = sshll.u32 %s6126_s12, 4  ;;  %s6038_s17 = int_to_ptr.vmem [resolvable:$false] %s6037_s17 }
  0x71   : > { %s6039_s20 = scalar_lea.vmem %s6038_s17, 1536  ;;  %p6040_p1 = scmp.lt.s32.totalorder %s409_s21, %s6038_s17 }
  0x72   : > { %p6035_p0 = pnand %p6033_p4, %p6262_p8  ;;  %p6041_p5 = scmp.lt.s32.totalorder %s6039_s20, %s6032_s26 }
  0x74   : > { %p6036_p13 = pneg %p6035_p0  ;;  %p6042_p9 = por %p6041_p5, %p6040_p1 }
  0x76   : > { %p6043_p10 = pnand %p6042_p9, %p6036_p13 }
  0x78   : > { %6046 = shalt.err (!%p6043_p10)
}
  0x79   : > { %5788 = dma.hbm_to_vmem [thread:$0]  (!%p6243_p6), %s6367_s1, 768, %s409_s21, %s6256_s16, %s7206_s11, %s7206_s11, %s7205_s10  }
  0x7a   : > { %p7208_p8 = scmp.ne.s32.totalorder %s7202_s27, 0 }
  0x7b   : > { %s6408_s23 = sand.u32 (!%p7208_p8), 1, %s6111_s18   ;;  %p7209_p11 = scmp.ne.s32.totalorder (!%p7208_p8), %s7196_s14, 0 }
  0x7c   : > { %420 = sbr.rel (%p7208_p8) target bundleno = 3081 (0xc09), region = 64  ;;  %s423_s24 = scalar_lea.sflag (!%p7208_p8), [#allocation3], %s6408_s23 }
  0x7d   : > { %s6411_s28 = smul.u32 (!%p7208_p8), 48, %s6408_s23 }
  0x7f   : > { %s6415_s29 = scalar_lea.vmem (!%p7208_p8), [#allocation2], %s6411_s28 }
  0x81   : > { %6090 = dma.done.wait (%p7209_p11), %s423_s24, 768  }
  0x82   : > { %6092 = vsyncadd (%p7209_p11), %s423_s24, 4294966528  ;;  %s431_s16 = sand.u32 1, %s6289_s25   ;;  %s6423_s10 = scalar_lea.vmem [#allocation5], %s6411_s28 }
  0x83   : > { %s432_s27 = scalar_lea.sflag [#allocation6], %s431_s16 }
  0x84   : > { %6094 = dma.done.wait (%p7209_p11), %s432_s27, 1536  }
  0x85   : > { %6096 = vsyncadd (%p7209_p11), %s432_s27, 4294965760  ;;  %s6430_s11 = scalar_lea.vmem [#allocation7], %s6411_s28  ;;  %p7210_p6 = scmp.eq.s32.totalorder %s6289_s25, 0 }
  0x87   : > { %6098 = dma.done.wait (%p7210_p6), [#allocation9], 512   ;;  %p7211_p12 = pmov %p7210_p6 }
  0x88   : > { %vm518_vm0 = vcmask 261120   ;;  %v510_v0 = vld [vmem:[%s7156_s3 + $0x18] sm:$0xff]  ;;  %v509_v1 = vld [vmem:[%s7156_s3 + $0x10] sm:$0xff]  ;;  %v508_v3 = vld [vmem:[%s7156_s3 + $0x8] sm:$0xff]  ;;  %v6127_v28 = vmov 0.0   ;;  %vm6128_vm1 = vmmov 0  }
  0x89   : > { %6100 = vsyncadd (%p7211_p12), [#allocation9], 4294966784  ;;  %5443 = vmatprep.subr.mxu0 %v510_v0  ;;  %v501_v2 = vld [vmem:[%s6415_s29] sm:$0xff]  ;;  %v641_v4 = vld [vmem:[%s7157_s4 + $0x18] sm:$0xff]  ;;  %vm892_vm2 = vcmask 64512   ;;  %s6129_s24 = smov 120  }
  0x8a   : > { %5444 = vmatpush3.msra.mxu0 %v510_v0  ;;  %5451 = vmatprep.mubr.msk.f32.mxu0 %vm518_vm0, %v501_v2  ;;  %v507_v5 = vld [vmem:[%s7156_s3] sm:$0xff]  ;;  %v640_v6 = vld [vmem:[%s7157_s4 + $0x10] sm:$0xff]  ;;  %v502_v7 = vld [vmem:[%s6415_s29 + $0x8] sm:$0xff]  ;;  %s6130_s16 = smov 112   ;;  %s6131_s27 = smov 104   ;;  %vm4907_vm3 = vcmask 130048  }
  0x8b   : > { %5445 = vmatprep.subr.mxu0 %v509_v1  ;;  %5751 = vmatprep.subr.mxu1 %v641_v4  ;;  %v639_v8 = vld [vmem:[%s7157_s4 + $0x8] sm:$0xff]  ;;  %v503_v9 = vld [vmem:[%s6415_s29 + $0x10] sm:$0xff]  ;;  %v505_v12 = vld [vmem:[%s6415_s29 + $0x20] sm:$0xff]  ;;  %s6132_s1 = smov 8   ;;  %s6134_s21 = smov 24   ;;  %vm4914_vm4 = vcmask 195584  }
  0x8c   : > { %5446 = vmatpush3.msra.mxu0 %v509_v1  ;;  %5755 = vmatpush3.msra.mxu1 %v641_v4  ;;  %v504_v10 = vld [vmem:[%s6415_s29 + $0x18] sm:$0xff]  ;;  %v638_v11 = vld [vmem:[%s7157_s4] sm:$0xff]  ;;  %v637_v14 = vld [vmem:[%s6423_s10 + $0x28] sm:$0xff]  ;;  %s7212_s14 = sld [smem:[#allocation23_spill]]  ;;  %s496_s19 = scalar_lea.vmem [#allocation10], %s6411_s28 }
  0x8d   : > { %5447 = vmatprep.subr.mxu0 %v508_v3  ;;  %5752 = vmatprep.subr.mxu1 %v640_v6  ;;  %v636_v13 = vld [vmem:[%s6423_s10 + $0x20] sm:$0xff]  ;;  %v506_v15 = vld [vmem:[%s6415_s29 + $0x28] sm:$0xff]  ;;  %v634_v18 = vld [vmem:[%s6423_s10 + $0x10] sm:$0xff]  ;;  %s6133_s29 = smov 16   ;;  %s5065_s13 = sshll.u32 %s496_s19, 4  ;;  %s7102_s13 = int_to_ptr.vmem [resolvable:$true] %s5065_s13 }
  0x8e   : > { %5448 = vmatpush3.msra.mxu0 %v508_v3  ;;  %5756 = vmatpush3.msra.mxu1 %v640_v6  ;;  %v632_v16 = vld [vmem:[%s6423_s10] sm:$0xff]  ;;  %v633_v17 = vld [vmem:[%s6423_s10 + $0x8] sm:$0xff]  ;;  %v635_v19 = vld [vmem:[%s6423_s10 + $0x18] sm:$0xff]  ;;  %s7213_s10 = sld [smem:[#allocation20_spill]]  ;;  %s5306_s30 = smul.u32 768, %s6289_s25 }
  0x8f   : > { %5449 = vmatprep.subr.mxu0 %v507_v5  ;;  %5753 = vmatprep.subr.mxu1 %v639_v8  ;;  %v771_v20 = vld [vmem:[%s7158_s5 + $0x18] sm:$0xff]  ;;  %v770_v21 = vld [vmem:[%s7158_s5 + $0x10] sm:$0xff]  ;;  %v769_v22 = vld [vmem:[%s7158_s5 + $0x8] sm:$0xff]  ;;  %s5052_s17 = scalar_lea.sflag [#allocation4], %s6408_s23  ;;  %s6047_s25 = scalar_lea.vmem %s7102_s13, 768 }
  0x90   : > { %5450 = vmatpush3.msra.mxu0 %v507_v5  ;;  %5757 = vmatpush3.msra.mxu1 %v639_v8  ;;  %v768_v23 = vld [vmem:[%s7158_s5] sm:$0xff]  ;;  %v763_v25 = vld [vmem:[%s6430_s11 + $0x8] sm:$0xff]  ;;  %v765_v27 = vld [vmem:[%s6430_s11 + $0x18] sm:$0xff]  ;;  %p6048_p2 = scmp.ne.s32.totalorder %s7102_s13, %s6047_s25  ;;  %s6135_s20 = smov [#allocation10]  }
  0x91   : > { %5452 = vmatmul.mubr.msk.f32.vlgmr.msra.gmra.mxu0 %vm518_vm0, %v502_v7  ;;  %5460 = vmatprep.subr.mxu0 %v641_v4  ;;  %v762_v24 = vld [vmem:[%s6430_s11] sm:$0xff]  ;;  %v764_v26 = vld [vmem:[%s6430_s11 + $0x10] sm:$0xff]  ;;  %v767_v30 = vld [vmem:[%s6430_s11 + $0x28] sm:$0xff] }
  0x92   : > { %5461 = vmatpush3.msra.mxu0 %v641_v4  ;;  %5454 = vmatprep.mubr.msk.f32.mxu0 %vm518_vm0, %v503_v9  ;;  %v766_v29 = vld [vmem:[%s6430_s11 + $0x20] sm:$0xff]  ;;  %s7214_s11 = sld [smem:[#allocation24_spill]] }
  0x93   : > { %5462 = vmatprep.subr.mxu0 %v640_v6  ;;  %5754 = vmatprep.subr.mxu1 %v638_v11  ;;  %v5207_v38 = vld [vmem:[%s7161_s8] ss:$0 sm:$0xff] }
  0x94   : > { %5463 = vmatpush3.msra.mxu0 %v640_v6  ;;  %5758 = vmatpush3.msra.mxu1 %v638_v11  ;;  %v5200_v43 = vld [vmem:[%s7160_s7] ss:$0 sm:$0xff]  ;;  %p7215_p3 = scmp.ne.s32.totalorder %s7213_s10, 0 }
  0x95   : > { %5455 = vmatmul.mubr.msk.f32.gmra.mxu0 %vm518_vm0, %v504_v10  ;;  %5464 = vmatprep.subr.mxu0 %v639_v8  ;;  %v6589_v57 = vld [vmem:[%s7162_s9] ss:$0 sm:$0xff] }
  0x96   : > { %5457 = vmatprep.mubr.msk.f32.mxu0 %vm518_vm0, %v505_v12  ;;  %5465 = vmatpush3.msra.mxu0 %v639_v8  ;;  %p6049_p7 = pnand %p6048_p2, %p7215_p3 }
  0x97   : > { %5466 = vmatprep.subr.mxu0 %v638_v11  ;;  %5474 = vmatprep.mubr.msk.f32.mxu1 %vm518_vm0, %v636_v13 }
  0x98   : > { %5467 = vmatpush3.msra.mxu0 %v638_v11  ;;  %5475 = vmatmul.mubr.msk.f32.vlgmr.msra.gmra.mxu1 %vm518_vm0, %v637_v14  ;;  %s7108_s12 = scalar_lea.hbm %s7214_s11, %s5306_s30  ;;  %p6050_p4 = pneg %p6049_p7 }
  0x99   : > { %5458 = vmatmul.mubr.msk.f32.gmra.mxu0 %vm518_vm0, %v506_v15  ;;  %5477 = vmatprep.subr.mxu0 %v771_v20 }
  0x9a   : > { %5468 = vmatprep.mubr.msk.f32.mxu0 %vm518_vm0, %v632_v16  ;;  %5494 = vmatprep.subr.mxu1 %v6127_v28 }
  0x9b   : > { %5496 = vmatprep.mubr.msk.f32.mxu1 %vm6128_vm1, %v6127_v28 }
  0x9d   : > { %5469 = vmatmul.mubr.msk.f32.vlgmr.msra.gmra.mxu0 %vm518_vm0, %v633_v17 }
  0x9e   : > { %5471 = vmatprep.mubr.msk.f32.mxu0 %vm518_vm0, %v634_v18  ;;  %5478 = vmatpush3.msra.mxu0 %v771_v20 }
  0x9f   : > { %5479 = vmatprep.subr.mxu0 %v770_v21 }
  0xa0   : > { %5480 = vmatpush3.msra.mxu0 %v770_v21 }
  0xa1   : > { %5472 = vmatmul.mubr.msk.f32.gmra.mxu0 %vm518_vm0, %v635_v19  ;;  %5481 = vmatprep.subr.mxu0 %v769_v22 }
  0xa2   : > { %5482 = vmatpush3.msra.mxu0 %v769_v22  ;;  %5485 = vmatprep.mubr.msk.f32.mxu0 %vm518_vm0, %v762_v24 }
  0xa3   : > { %5483 = vmatprep.subr.mxu0 %v768_v23 }
  0xa4   : > { %5484 = vmatpush3.msra.mxu0 %v768_v23 }
  0xa5   : > { %5486 = vmatmul.mubr.msk.f32.vlgmr.msra.gmra.mxu0 %vm518_vm0, %v763_v25  ;;  %5509 = vmatprep.subr.mxu0 %v6127_v28 }
  0xa6   : > { %5488 = vmatprep.mubr.msk.f32.mxu0 %vm518_vm0, %v764_v26 }
  0xa9   : > { %5489 = vmatmul.mubr.msk.f32.gmra.mxu0 %vm518_vm0, %v765_v27 }
  0xaa   : > { %5491 = vmatprep.mubr.msk.f32.mxu0 %vm518_vm0, %v766_v29 }
  0xad   : > { %5492 = vmatmul.mubr.msk.f32.gmra.mxu0 %vm518_vm0, %v767_v30 }
  0xae   : > { %5511 = vmatprep.mubr.msk.f32.mxu0 %vm6128_vm1, %v6127_v28 }
 0x151   : > { %v5453_v31 = vpop.f32.mrf.mxu0 }
 0x152   : > { %v6544_v50 = vadd.f32 %v5453_v31, %v5200_v43 }
 0x153   : > { %v603_v32 = vpop.f32.mrf.mxu0 }
 0x154   : > { %v6526_v45 = vadd.f32 %v5200_v43, %v603_v32 }
 0x155   : > { %v5456_v33 = vpop.f32.mrf.mxu0 }
 0x156   : > { %v6535_v48 = vadd.f32 %v5456_v33, %v5200_v43 }
 0x157   : > { %v613_v34 = vpop.f32.mrf.mxu0 }
 0x158   : > { %v5476_v42 = vpop.f32.mrf.mxu1  ;;  %v6566_v55 = vadd.f32 %v5200_v43, %v613_v34 }
 0x159   : > { %v5459_v35 = vpop.f32.mrf.mxu0  ;;  %v6533_v47 = vadd.f32 %v5476_v42, %v5207_v38 }
 0x15a   : > { %v753_v51 = vpop.f32.mrf.mxu1  ;;  %v6555_v53 = vadd.f32 %v5459_v35, %v5200_v43 }
 0x15b   : > { %v623_v36 = vpop.f32.mrf.mxu0  ;;  %v6562_v54 = vadd.f32 %v5207_v38, %v753_v51 }
 0x15c   : > { %v6579_v56 = vadd.f32 %v5200_v43, %v623_v36 }
 0x15d   : > { %v5470_v37 = vpop.f32.mrf.mxu0 }
 0x15e   : > { %v6529_v46 = vadd.f32 %v5470_v37, %v5207_v38 }
 0x15f   : > { %v733_v39 = vpop.f32.mrf.mxu0 }
 0x160   : > { %v6517_v40 = vadd.f32 %v5207_v38, %v733_v39 }
 0x161   : > { %v5473_v41 = vpop.f32.mrf.mxu0 }
 0x162   : > { %v6522_v44 = vadd.f32 %v5473_v41, %v5207_v38  ;;  %5495 = vmatpush3.xpose.msk.msra.mxu1 %vm892_vm2, %v6517_v40 }
 0x163   : > { %5499 = vmatprep.subr.mxu1 %v6127_v28  ;;  %v743_v49 = vpop.f32.mrf.mxu0 }
 0x164   : > { %5510 = vmatpush3.xpose.msk.msra.mxu0 %vm892_vm2, %v6522_v44  ;;  %v6549_v52 = vadd.f32 %v5207_v38, %v743_v49 }
 0x165   : > { %5497 = vmatmul.mubr.msk.f32.vlgmr.msra.gmra.mxu1 %vm892_vm2, %v6526_v45  ;;  %5519 = vmatprep.subr.mxu0 %v6127_v28  ;;  %v5487_v58 = vpop.f32.mrf.mxu0 }
 0x166   : > { %5500 = vmatpush3.xpose.msk.msra.mxu1 %vm892_vm2, %v6529_v46  ;;  %5501 = vmatprep.mubr.msk.f32.mxu1 %vm6128_vm1, %v6127_v28  ;;  %v6592_v59 = vadd.f32 %v5487_v58, %v6589_v57 }
 0x167   : > { %5512 = vmatmul.mubr.msk.f32.vlgmr.msra.gmra.mxu0 %vm892_vm2, %v6535_v48  ;;  %5504 = vmatprep.subr.mxu1 %v6127_v28  ;;  %v863_v60 = vpop.f32.mrf.mxu0 }
 0x168   : > { %5520 = vmatpush3.xpose.msk.msra.mxu0 %vm892_vm2, %v6533_v47  ;;  %5521 = vmatprep.mubr.msk.f32.mxu0 %vm6128_vm1, %v6127_v28  ;;  %v6595_v61 = vadd.f32 %v6589_v57, %v863_v60 }
 0x169   : > { %5502 = vmatmul.mubr.msk.f32.vlgmr.msra.gmra.mxu1 %vm892_vm2, %v6544_v50  ;;  %5529 = vmatprep.subr.mxu0 %v6127_v28  ;;  %v5490_v62 = vpop.f32.mrf.mxu0 }
 0x16a   : > { %5505 = vmatpush3.xpose.msk.msra.mxu1 %vm892_vm2, %v6549_v52  ;;  %5506 = vmatprep.mubr.msk.f32.mxu1 %vm6128_vm1, %v6127_v28  ;;  %v6600_v63 = vadd.f32 %v5490_v62, %v6589_v57 }
 0x16b   : > { %5522 = vmatmul.mubr.msk.f32.vlgmr.msra.gmra.mxu0 %vm892_vm2, %v6555_v53  ;;  %5514 = vmatprep.subr.mxu1 %v6127_v28  ;;  %v873_v0 = vpop.f32.mrf.mxu0 }
 0x16c   : > { %5531 = vmatprep.mubr.msk.f32.mxu0 %vm6128_vm1, %v6127_v28  ;;  %5530 = vmatpush3.msra.mxu0 %v6592_v59  ;;  %v6605_v1 = vadd.f32 %v6589_v57, %v873_v0 }
 0x16d   : > { %5507 = vmatmul.mubr.msk.f32.vlgmr.msra.gmra.mxu1 %vm892_vm2, %v6566_v55  ;;  %5539 = vmatprep.subr.mxu0 %v6127_v28  ;;  %v5493_v2 = vpop.f32.mrf.mxu0 }
 0x16e   : > { %5515 = vmatpush3.xpose.msk.msra.mxu1 %vm892_vm2, %v6562_v54  ;;  %5516 = vmatprep.mubr.msk.f32.mxu1 %vm6128_vm1, %v6127_v28  ;;  %v6608_v3 = vadd.f32 %v5493_v2, %v6589_v57 }
 0x16f   : > { %5524 = vmatprep.subr.mxu1 %v6127_v28  ;;  %v6610_v4 = vpop.f32.mrf.mxu0 }
 0x171   : > { %5517 = vmatmul.mubr.msk.f32.vlgmr.msra.gmra.mxu1 %vm892_vm2, %v6579_v56 }
 0x172   : > { %5526 = vmatprep.mubr.msk.f32.mxu1 %vm6128_vm1, %v6127_v28  ;;  %5525 = vmatpush3.msra.mxu1 %v6595_v61 }
 0x173   : > { %5534 = vmatprep.subr.mxu1 %v6127_v28 }
 0x225   : > { %v965_v5 = vpop.f32.mrf.mxu1 }
 0x226   : > { %v1349_v6 = vsel %vm892_vm2, %v965_v5, -inf }
 0x227   : > { %v1193_v7 = vpop.f32.mrf.mxu0  ;;  %1350 = vmax.xlane.f32.xlu0 %v1349_v6  ;;  %v5498_v8 = vpop.f32.mrf.mxu1 }
 0x228   : > { %v1358_v19 = vsel %vm892_vm2, %v1193_v7, -inf }
 0x229   : > { %v1041_v9 = vpop.f32.mrf.mxu1  ;;  %v5513_v10 = vpop.f32.mrf.mxu0 }
 0x22a   : > { %v1352_v11 = vsel %vm892_vm2, %v1041_v9, -inf }
 0x22b   : > { %v1345_v12 = vpop.f32.mrf.mxu0  ;;  %1353 = vmax.xlane.f32.xlu0 %v1352_v11  ;;  %v5503_v13 = vpop.f32.mrf.mxu1 }
 0x22c   : > { %v1364_v22 = vsel %vm892_vm2, %v1345_v12, -inf }
 0x22d   : > { %v1117_v14 = vpop.f32.mrf.mxu1  ;;  %v5523_v15 = vpop.f32.mrf.mxu0 }
 0x22e   : > { %v1355_v16 = vsel %vm892_vm2, %v1117_v14, -inf }
 0x22f   : > { %1356 = vmax.xlane.f32.xlu1 %v1355_v16  ;;  %v5508_v17 = vpop.f32.mrf.mxu1 }
 0x231   : > { %v1269_v18 = vpop.f32.mrf.mxu1 }
 0x232   : > { %v1361_v20 = vsel %vm892_vm2, %v1269_v18, -inf }
 0x233   : > { %1359 = vmax.xlane.f32.xlu1 %v1358_v19  ;;  %1362 = vmax.xlane.f32.xlu0 %v1361_v20  ;;  %v5518_v21 = vpop.f32.mrf.mxu1 }
 0x237   : > { %1365 = vmax.xlane.f32.xlu1 %v1364_v22 }
 0x248   : > { %1933 = vrot.lane.b32.xlu1 %v6529_v46, %s6129_s24 }
 0x249   : > { %1855 = vrot.lane.b32.xlu0 %v6517_v40, %s6129_s24 }
 0x24c   : > { %1853 = vrot.lane.b32.xlu1 %v6526_v45, %s6129_s24 }
 0x250   : > { %1931 = vrot.lane.b32.xlu1 %v6544_v50, %s6129_s24 }
 0x2b0   : > { %v1351_v23 = vpop.xlane.xlu0 %1350 }
 0x2b1   : > { %v1367_v24 = vsub.f32 %v965_v5, %v1351_v23 }
 0x2b3   : > { %v1373_v25 = vmul.f32 1.442695, %v1367_v24  ;;  %v6665_v24 = vadd.f32 %v6589_v57, %v6610_v4 }
 0x2b4   : > { %v1354_v26 = vpop.xlane.xlu0 %1353 }
 0x2b5   : > { %5841 = vpow2.f32 %v1373_v25  ;;  %v1368_v30 = vsub.f32 %v1041_v9, %v1354_v26 }
 0x2b7   : > { %v1375_v36 = vmul.f32 1.442695, %v1368_v30 }
 0x2b8   : > { %v1357_v27 = vpop.xlane.xlu1 %1356 }
 0x2b9   : > { %v1369_v29 = vsub.f32 %v1117_v14, %v1357_v27 }
 0x2bb   : > { %v1377_v31 = vmul.f32 1.442695, %v1369_v29 }
 0x2bc   : > { %v1360_v32 = vpop.xlane.xlu1 %1359  ;;  %v1363_v33 = vpop.xlane.xlu0 %1362 }
 0x2bd   : > { %5843 = vpow2.f32 %v1377_v31  ;;  %v1370_v34 = vsub.f32 %v1193_v7, %v1360_v32  ;;  %v1371_v35 = vsub.f32 %v1269_v18, %v1363_v33 }
 0x2bf   : > { %v1379_v37 = vmul.f32 1.442695, %v1370_v34  ;;  %v1381_v38 = vmul.f32 1.442695, %v1371_v35 }
 0x2c0   : > { %v1366_v39 = vpop.xlane.xlu1 %1365  ;;  %v1856_v9 = vpop.permute.xlu0 %1855 }
 0x2c1   : > { %5845 = vpow2.f32 %v1379_v37  ;;  %v1372_v41 = vsub.f32 %v1345_v12, %v1366_v39 }
 0x2c2   : > { %v5842_v42 = vpop.eup %5841  ;;  %5847 = vpow2.f32 %v1381_v38 }
 0x2c3   : > { %5849 = vpow2.f32 %v1375_v36  ;;  %v1383_v43 = vmul.f32 1.442695, %v1372_v41  ;;  %v1385_v49 = vsel %vm892_vm2, %v5842_v42, 0.0 }
 0x2c4   : > { %1386 = vadd.xlane.f32.xlu0 %v1385_v49  ;;  %v6654_v10 = vpop.permute.xlu1 %1933 }
 0x2c5   : > { %5851 = vpow2.f32 %v1383_v43 }
 0x2c8   : > { %v1854_v12 = vpop.permute.xlu1 %1853 }
 0x2ca   : > { %v5844_v51 = vpop.eup %5843 }
 0x2cb   : > { %v1391_v58 = vsel %vm892_vm2, %v5844_v51, 0.0 }
 0x2cc   : > { %1392 = vadd.xlane.f32.xlu0 %v1391_v58  ;;  %v6656_v13 = vpop.permute.xlu1 %1931 }
 0x2ce   : > { %v6628_v60 = vpop.eup %5845 }
 0x2cf   : > { %v5848_v62 = vpop.eup %5847  ;;  %v1394_v0 = vsel %vm892_vm2, %v6628_v60, 0.0 }
 0x2d0   : > { %v5850_v2 = vpop.eup %5849  ;;  %1395 = vadd.xlane.f32.xlu1 %v1394_v0  ;;  %v1397_v5 = vsel %vm892_vm2, %v5848_v62, 0.0 }
 0x2d1   : > { %1398 = vadd.xlane.f32.xlu0 %v1397_v5  ;;  %v1388_v6 = vsel %vm892_vm2, %v5850_v2, 0.0 }
 0x2d2   : > { %v6634_v7 = vpop.eup %5851 }
 0x2d3   : > { %v1400_v8 = vsel %vm892_vm2, %v6634_v7, 0.0 }
 0x2d4   : > { %1389 = vadd.xlane.f32.xlu1 %v1388_v6 }
 0x2d8   : > { %1401 = vadd.xlane.f32.xlu1 %v1400_v8 }
 0x2e7   : > { %2011 = vrot.lane.b32.xlu0 %v6549_v52, %s6129_s24 }
 0x2e9   : > { %2089 = vrot.lane.b32.xlu1 %v6522_v44, %s6129_s24 }
 0x2eb   : > { %2009 = vrot.lane.b32.xlu0 %v6566_v55, %s6129_s24 }
 0x2ed   : > { %2087 = vrot.lane.b32.xlu1 %v6535_v48, %s6129_s24 }
 0x2ef   : > { %2167 = vrot.lane.b32.xlu0 %v6562_v54, %s6129_s24 }
 0x2f1   : > { %2245 = vrot.lane.b32.xlu1 %v6533_v47, %s6129_s24 }
 0x2f3   : > { %2165 = vrot.lane.b32.xlu0 %v6579_v56, %s6129_s24 }
 0x2f5   : > { %2243 = vrot.lane.b32.xlu1 %v6555_v53, %s6129_s24 }
 0x34d   : > { %v1387_v11 = vpop.xlane.xlu0 %1386 }
 0x34e   : > { %5853 = vrcp.f32 %v1387_v11 }
 0x355   : > { %v1393_v14 = vpop.xlane.xlu0 %1392 }
 0x356   : > { %5855 = vrcp.f32 %v1393_v14 }
 0x359   : > { %v1396_v15 = vpop.xlane.xlu1 %1395 }
 0x35a   : > { %v1399_v16 = vpop.xlane.xlu0 %1398 }
 0x35b   : > { %v5854_v17 = vpop.eup %5853  ;;  %5857 = vrcp.f32 %v1399_v16 }
 0x35c   : > { %v1409_v18 = vmul.f32 %v5854_v17, %v5842_v42 }
 0x35d   : > { %v1390_v19 = vpop.xlane.xlu1 %1389 }
 0x35e   : > { %5859 = vrcp.f32 %v1390_v19  ;;  %5527 = vmatmul.mubr.msk.f32.vlgmr.msra.gmra.mxu1 %vm892_vm2, %v1409_v18  ;;  %v2012_v22 = vpop.permute.xlu0 %2011 }
 0x35f   : > { %5535 = vmatpush3.msra.mxu1 %v6605_v1  ;;  %5536 = vmatprep.mubr.msk.f32.mxu1 %vm6128_vm1, %v6127_v28  ;;  %5861 = vrcp.f32 %v1396_v15 }
 0x360   : > { %5544 = vmatprep.subr.mxu1 %v6127_v28 }
 0x361   : > { %v1402_v20 = vpop.xlane.xlu1 %1401 }
 0x362   : > { %5863 = vrcp.f32 %v1402_v20  ;;  %v2010_v27 = vpop.permute.xlu0 %2009 }
 0x363   : > { %v5856_v21 = vpop.eup %5855 }
 0x364   : > { %v1411_v23 = vmul.f32 %v5856_v21, %v5844_v51 }
 0x365   : > { %v2090_v30 = vpop.permute.xlu1 %2089 }
 0x366   : > { %5537 = vmatmul.mubr.msk.f32.vlgmr.msra.gmra.mxu1 %vm892_vm2, %v1411_v23  ;;  %v2168_v31 = vpop.permute.xlu0 %2167 }
 0x367   : > { %5545 = vmatpush3.msra.mxu1 %v6665_v24  ;;  %5546 = vmatprep.mubr.msk.f32.mxu1 %vm6128_vm1, %v6127_v28 }
 0x368   : > { %v5858_v25 = vpop.eup %5857  ;;  %5554 = vmatprep.subr.mxu1 %v6127_v28 }
 0x369   : > { %v1413_v26 = vmul.f32 %v5858_v25, %v5848_v62  ;;  %v2088_v35 = vpop.permute.xlu1 %2087 }
 0x36a   : > { %v2166_v36 = vpop.permute.xlu0 %2165 }
 0x36b   : > { %v5860_v29 = vpop.eup %5859  ;;  %5547 = vmatmul.mubr.msk.f32.vlgmr.msra.gmra.mxu1 %vm892_vm2, %v1413_v26 }
 0x36c   : > { %5555 = vmatpush3.xpose.msk.msra.mxu1 %vm892_vm2, %v1856_v9  ;;  %5556 = vmatprep.mubr.msk.f32.mxu1 %vm6128_vm1, %v6127_v28  ;;  %v1410_v57 = vmul.f32 %v5860_v29, %v5850_v2  ;;  %v5862_v4 = vpop.eup %5861 }
 0x36d   : > { %5564 = vmatprep.subr.mxu1 %v6127_v28  ;;  %v1412_v32 = vmul.f32 %v5862_v4, %v6628_v60  ;;  %v2246_v37 = vpop.permute.xlu1 %2245 }
 0x36e   : > { %5532 = vmatmul.mubr.msk.f32.vlgmr.msra.gmra.mxu0 %vm892_vm2, %v1410_v57 }
 0x36f   : > { %5540 = vmatpush3.msra.mxu0 %v6600_v63  ;;  %5557 = vmatmul.mubr.msk.f32.vlgmr.msra.gmra.mxu1 %vm892_vm2, %v1854_v12  ;;  %v5864_v33 = vpop.eup %5863 }
 0x370   : > { %5565 = vmatpush3.xpose.msk.msra.mxu1 %vm892_vm2, %v2012_v22  ;;  %5541 = vmatprep.mubr.msk.f32.mxu0 %vm6128_vm1, %v6127_v28  ;;  %v1414_v34 = vmul.f32 %v5864_v33, %v6634_v7 }
 0x371   : > { %5549 = vmatprep.subr.mxu0 %v6127_v28  ;;  %5566 = vmatprep.mubr.msk.f32.mxu1 %vm6128_vm1, %v6127_v28  ;;  %v2244_v38 = vpop.permute.xlu1 %2243 }
 0x372   : > { %5574 = vmatprep.subr.mxu1 %v6127_v28  ;;  %5542 = vmatmul.mubr.msk.f32.vlgmr.msra.gmra.mxu0 %vm892_vm2, %v1412_v32 }
 0x373   : > { %5550 = vmatpush3.msra.mxu0 %v6608_v3  ;;  %5567 = vmatmul.mubr.msk.f32.vlgmr.msra.gmra.mxu1 %vm892_vm2, %v2010_v27 }
 0x374   : > { %5575 = vmatpush3.xpose.msk.msra.mxu1 %vm892_vm2, %v2168_v31  ;;  %5551 = vmatprep.mubr.msk.f32.mxu0 %vm6128_vm1, %v6127_v28 }
 0x375   : > { %5559 = vmatprep.subr.mxu0 %v6127_v28  ;;  %5576 = vmatprep.mubr.msk.f32.mxu1 %vm6128_vm1, %v6127_v28 }
 0x376   : > { %5552 = vmatmul.mubr.msk.f32.vlgmr.msra.gmra.mxu0 %vm892_vm2, %v1414_v34  ;;  %5584 = vmatprep.subr.mxu1 %v6127_v28 }
 0x377   : > { %5560 = vmatpush3.xpose.msk.msra.mxu0 %vm892_vm2, %v6654_v10  ;;  %5577 = vmatmul.mubr.msk.f32.vlgmr.msra.gmra.mxu1 %vm892_vm2, %v2166_v36 }
 0x378   : > { %5561 = vmatprep.mubr.msk.f32.mxu0 %vm6128_vm1, %v6127_v28  ;;  %5569 = vmatprep.subr.mxu0 %v6127_v28 }
 0x379   : > { %5586 = vmatprep.mubr.msk.f32.mxu1 %vm6128_vm1, %v6127_v28 }
 0x37a   : > { %5562 = vmatmul.mubr.msk.f32.vlgmr.msra.gmra.mxu0 %vm892_vm2, %v6656_v13 }
 0x37b   : > { %5570 = vmatpush3.xpose.msk.msra.mxu0 %vm892_vm2, %v2090_v30  ;;  %5571 = vmatprep.mubr.msk.f32.mxu0 %vm6128_vm1, %v6127_v28 }
 0x37c   : > { %5579 = vmatprep.subr.mxu0 %v6127_v28 }
 0x37e   : > { %5572 = vmatmul.mubr.msk.f32.vlgmr.msra.gmra.mxu0 %vm892_vm2, %v2088_v35 }
 0x37f   : > { %5580 = vmatpush3.xpose.msk.msra.mxu0 %vm892_vm2, %v2246_v37  ;;  %5581 = vmatprep.mubr.msk.f32.mxu0 %vm6128_vm1, %v6127_v28 }
 0x380   : > { %5589 = vmatprep.subr.mxu0 %v6127_v28 }
 0x382   : > { %5582 = vmatmul.mubr.msk.f32.vlgmr.msra.gmra.mxu0 %vm892_vm2, %v2244_v38 }
 0x383   : > { %5591 = vmatprep.mubr.msk.f32.mxu0 %vm6128_vm1, %v6127_v28 }
 0x41e   : > { %v6722_v39 = vpop.f32.mrf.mxu1 }
 0x420   : > { %v5528_v41 = vpop.f32.mrf.mxu1 }
 0x426   : > { %v6724_v42 = vpop.f32.mrf.mxu1 }
 0x428   : > { %v5538_v43 = vpop.f32.mrf.mxu1 }
 0x42b   : > { %v6726_v49 = vpop.f32.mrf.mxu1 }
 0x42d   : > { %v5548_v51 = vpop.f32.mrf.mxu1 }
 0x42e   : > { %v6728_v58 = vpop.f32.mrf.mxu0 }
 0x42f   : > { %v1927_v60 = vpop.f32.mrf.mxu1 }
 0x430   : > { %v5533_v62 = vpop.f32.mrf.mxu0  ;;  %v2321_v0 = vsel %vm892_vm2, %v1927_v60, -inf }
 0x431   : > { %2322 = vmax.xlane.f32.xlu0 %v2321_v0  ;;  %v5558_v2 = vpop.f32.mrf.mxu1 }
 0x432   : > { %v6731_v5 = vpop.f32.mrf.mxu0 }
 0x433   : > { %v2083_v6 = vpop.f32.mrf.mxu1 }
 0x434   : > { %v5543_v7 = vpop.f32.mrf.mxu0  ;;  %v2327_v8 = vsel %vm892_vm2, %v2083_v6, -inf }
 0x435   : > { %2328 = vmax.xlane.f32.xlu0 %v2327_v8  ;;  %v5568_v9 = vpop.f32.mrf.mxu1 }
 0x436   : > { %v6734_v10 = vpop.f32.mrf.mxu0 }
 0x437   : > { %v2239_v11 = vpop.f32.mrf.mxu1 }
 0x438   : > { %v5553_v12 = vpop.f32.mrf.mxu0  ;;  %v2333_v21 = vsel %vm892_vm2, %v2239_v11, -inf }
 0x439   : > { %v5578_v13 = vpop.f32.mrf.mxu1 }
 0x43a   : > { %v2005_v14 = vpop.f32.mrf.mxu0 }
 0x43b   : > { %v2324_v15 = vsel %vm892_vm2, %v2005_v14, -inf }
 0x43c   : > { %2325 = vmax.xlane.f32.xlu1 %v2324_v15  ;;  %v5563_v16 = vpop.f32.mrf.mxu0 }
 0x43e   : > { %v2161_v17 = vpop.f32.mrf.mxu0 }
 0x43f   : > { %v2330_v18 = vsel %vm892_vm2, %v2161_v17, -inf }
 0x440   : > { %v5573_v19 = vpop.f32.mrf.mxu0  ;;  %2331 = vmax.xlane.f32.xlu0 %v2330_v18 }
 0x442   : > { %v6738_v20 = vpop.f32.mrf.mxu0 }
 0x443   : > { %v2336_v23 = vsel %vm892_vm2, %v6738_v20, -inf }
 0x444   : > { %v5583_v22 = vpop.f32.mrf.mxu0  ;;  %2334 = vmax.xlane.f32.xlu0 %v2333_v21 }
 0x44d   : > { %2465 = vrot.lane.b32.xlu1 %v6592_v59, %s6129_s24 }
 0x451   : > { %2542 = vrot.lane.b32.xlu1 %v6605_v1, %s6129_s24 }
 0x455   : > { %2619 = vrot.lane.b32.xlu1 %v6600_v63, %s6129_s24 }
 0x459   : > { %2773 = vrot.lane.b32.xlu1 %v6608_v3, %s6129_s24 }
 0x45a   : > { %2388 = vrot.lane.b32.xlu0 %v6595_v61, %s6129_s24 }
 0x45d   : > { %2929 = vrot.lane.b32.xlu1 %v6529_v46, %s6130_s16 }
 0x45e   : > { %2696 = vrot.lane.b32.xlu0 %v6665_v24, %s6129_s24  ;;  %s6051_s24 = sshll.u32 %s6135_s20, 4  ;;  %s6052_s24 = int_to_ptr.vmem [resolvable:$false] %s6051_s24 }
 0x45f   : > { %p6054_p0 = scmp.lt.s32.totalorder %s7102_s13, %s6052_s24 }
 0x462   : > { %2851 = vrot.lane.b32.xlu0 %v6517_v40, %s6130_s16 }
 0x466   : > { %2849 = vrot.lane.b32.xlu0 %v6526_v45, %s6130_s16 }
 0x481   : > { %2337 = vmax.xlane.f32.xlu1 %v2336_v23 }
 0x492   : > { %2927 = vrot.lane.b32.xlu1 %v6544_v50, %s6130_s16 }
 0x4ba   : > { %v2323_v25 = vpop.xlane.xlu0 %2322 }
 0x4bb   : > { %v2339_v26 = vsub.f32 %v1927_v60, %v2323_v25 }
 0x4bd   : > { %v2345_v27 = vmul.f32 1.442695, %v2339_v26 }
 0x4be   : > { %v2329_v29 = vpop.xlane.xlu0 %2328 }
 0x4bf   : > { %5865 = vpow2.f32 %v2345_v27  ;;  %v2341_v57 = vsub.f32 %v2083_v6, %v2329_v29 }
 0x4c1   : > { %v2349_v4 = vmul.f32 1.442695, %v2341_v57 }
 0x4c3   : > { %5867 = vpow2.f32 %v2349_v4 }
 0x4c5   : > { %v2326_v30 = vpop.xlane.xlu1 %2325 }
 0x4c6   : > { %v2340_v31 = vsub.f32 %v2005_v14, %v2326_v30 }
 0x4c8   : > { %v2347_v32 = vmul.f32 1.442695, %v2340_v31 }
 0x4c9   : > { %v2466_v33 = vpop.permute.xlu1 %2465  ;;  %v2332_v34 = vpop.xlane.xlu0 %2331 }
 0x4ca   : > { %5869 = vpow2.f32 %v2347_v32  ;;  %v2342_v35 = vsub.f32 %v2161_v17, %v2332_v34  ;;  %5590 = vmatpush3.msra.mxu0 %v2466_v33 }
 0x4cb   : > { %5599 = vmatprep.subr.mxu0 %v6127_v28 }
 0x4cc   : > { %v5866_v36 = vpop.eup %5865  ;;  %v2351_v37 = vmul.f32 1.442695, %v2342_v35 }
 0x4cd   : > { %v2357_v38 = vsel %vm892_vm2, %v5866_v36, 0.0  ;;  %v2335_v41 = vpop.xlane.xlu0 %2334  ;;  %v2543_v12 = vpop.permute.xlu1 %2542 }
 0x4ce   : > { %5871 = vpow2.f32 %v2351_v37  ;;  %2358 = vadd.xlane.f32.xlu0 %v2357_v38  ;;  %v2343_v43 = vsub.f32 %v2239_v11, %v2335_v41 }
 0x4d0   : > { %v5868_v51 = vpop.eup %5867  ;;  %v2353_v60 = vmul.f32 1.442695, %v2343_v43 }
 0x4d1   : > { %v2363_v62 = vsel %vm892_vm2, %v5868_v51, 0.0  ;;  %v2389_v0 = vpop.permute.xlu0 %2388  ;;  %v2620_v13 = vpop.permute.xlu1 %2619 }
 0x4d2   : > { %5873 = vpow2.f32 %v2353_v60  ;;  %2364 = vadd.xlane.f32.xlu0 %v2363_v62  ;;  %5585 = vmatpush3.msra.mxu1 %v2389_v0 }
 0x4d3   : > { %5594 = vmatprep.subr.mxu1 %v6127_v28 }
 0x4d5   : > { %v2774_v14 = vpop.permute.xlu1 %2773  ;;  %v2697_v22 = vpop.permute.xlu0 %2696 }
 0x4d7   : > { %v5870_v2 = vpop.eup %5869 }
 0x4d8   : > { %v2360_v6 = vsel %vm892_vm2, %v5870_v2, 0.0 }
 0x4d9   : > { %2361 = vadd.xlane.f32.xlu1 %v2360_v6  ;;  %v6782_v15 = vpop.permute.xlu1 %2929  ;;  %v2852_v23 = vpop.permute.xlu0 %2851 }
 0x4db   : > { %v5872_v7 = vpop.eup %5871 }
 0x4dc   : > { %v2366_v8 = vsel %vm892_vm2, %v5872_v7, 0.0 }
 0x4dd   : > { %2367 = vadd.xlane.f32.xlu1 %v2366_v8  ;;  %v2850_v25 = vpop.permute.xlu0 %2849 }
 0x4df   : > { %v5874_v9 = vpop.eup %5873 }
 0x4e0   : > { %v2369_v11 = vsel %vm892_vm2, %v5874_v9, 0.0 }
 0x4e1   : > { %2370 = vadd.xlane.f32.xlu0 %v2369_v11 }
 0x4ee   : > { %3085 = vrot.lane.b32.xlu1 %v6522_v44, %s6130_s16 }
 0x4f2   : > { %3083 = vrot.lane.b32.xlu1 %v6535_v48, %s6130_s16 }
 0x4f7   : > { %3007 = vrot.lane.b32.xlu0 %v6549_v52, %s6130_s16 }
 0x4fb   : > { %3005 = vrot.lane.b32.xlu0 %v6566_v55, %s6130_s16 }
 0x4ff   : > { %3163 = vrot.lane.b32.xlu0 %v6562_v54, %s6130_s16 }
 0x503   : > { %3161 = vrot.lane.b32.xlu0 %v6579_v56, %s6130_s16 }
 0x50a   : > { %v2338_v16 = vpop.xlane.xlu1 %2337 }
 0x50b   : > { %v2344_v17 = vsub.f32 %v6738_v20, %v2338_v16 }
 0x50d   : > { %v2355_v18 = vmul.f32 1.442695, %v2344_v17 }
 0x50e   : > { %v2928_v27 = vpop.permute.xlu1 %2927 }
 0x50f   : > { %5875 = vpow2.f32 %v2355_v18 }
 0x51c   : > { %v6785_v19 = vpop.eup %5875 }
 0x51d   : > { %v2372_v21 = vsel %vm892_vm2, %v6785_v19, 0.0 }
 0x51e   : > { %2373 = vadd.xlane.f32.xlu1 %v2372_v21 }
 0x52f   : > { %3241 = vrot.lane.b32.xlu1 %v6533_v47, %s6130_s16 }
 0x533   : > { %3239 = vrot.lane.b32.xlu1 %v6555_v53, %s6130_s16 }
 0x557   : > { %v2359_v26 = vpop.xlane.xlu0 %2358 }
 0x558   : > { %5877 = vrcp.f32 %v2359_v26 }
 0x55b   : > { %v2365_v20 = vpop.xlane.xlu0 %2364 }
 0x55c   : > { %5879 = vrcp.f32 %v2365_v20 }
 0x562   : > { %v2362_v29 = vpop.xlane.xlu1 %2361 }
 0x563   : > { %5881 = vrcp.f32 %v2362_v29 }
 0x565   : > { %v5878_v57 = vpop.eup %5877 }
 0x566   : > { %v2368_v4 = vpop.xlane.xlu1 %2367  ;;  %v2381_v30 = vmul.f32 %v5878_v57, %v5866_v36 }
 0x567   : > { %5883 = vrcp.f32 %v2368_v4 }
 0x568   : > { %5587 = vmatmul.mubr.msk.f32.vlgmr.msra.gmra.mxu1 %vm892_vm2, %v2381_v30 }
 0x569   : > { %v5880_v31 = vpop.eup %5879  ;;  %5595 = vmatpush3.msra.mxu1 %v2543_v12  ;;  %5596 = vmatprep.mubr.msk.f32.mxu1 %vm6128_vm1, %v6127_v28 }
 0x56a   : > { %5604 = vmatprep.subr.mxu1 %v6127_v28  ;;  %v2371_v32 = vpop.xlane.xlu0 %2370  ;;  %v2383_v33 = vmul.f32 %v5880_v31, %v5868_v51  ;;  %v3086_v0 = vpop.permute.xlu1 %3085 }
 0x56b   : > { %5885 = vrcp.f32 %v2371_v32 }
 0x56c   : > { %5597 = vmatmul.mubr.msk.f32.vlgmr.msra.gmra.mxu1 %vm892_vm2, %v2383_v33 }
 0x56d   : > { %5605 = vmatpush3.msra.mxu1 %v2697_v22  ;;  %5606 = vmatprep.mubr.msk.f32.mxu1 %vm6128_vm1, %v6127_v28 }
 0x56e   : > { %5614 = vmatprep.subr.mxu1 %v6127_v28  ;;  %v3008_v37 = vpop.permute.xlu0 %3007 }
 0x570   : > { %v5882_v34 = vpop.eup %5881 }
 0x571   : > { %v2382_v35 = vmul.f32 %v5882_v34, %v5870_v2  ;;  %v3084_v2 = vpop.permute.xlu1 %3083 }
 0x572   : > { %v3006_v51 = vpop.permute.xlu0 %3005 }
 0x573   : > { %5592 = vmatmul.mubr.msk.f32.vlgmr.msra.gmra.mxu0 %vm892_vm2, %v2382_v35 }
 0x574   : > { %v5884_v36 = vpop.eup %5883  ;;  %5600 = vmatpush3.msra.mxu0 %v2620_v13  ;;  %5601 = vmatprep.mubr.msk.f32.mxu0 %vm6128_vm1, %v6127_v28 }
 0x575   : > { %5609 = vmatprep.subr.mxu0 %v6127_v28  ;;  %v2384_v38 = vmul.f32 %v5884_v36, %v5872_v7 }
 0x576   : > { %v3164_v60 = vpop.permute.xlu0 %3163 }
 0x577   : > { %5602 = vmatmul.mubr.msk.f32.vlgmr.msra.gmra.mxu0 %vm892_vm2, %v2384_v38 }
 0x578   : > { %v5886_v41 = vpop.eup %5885  ;;  %5610 = vmatpush3.msra.mxu0 %v2774_v14  ;;  %5611 = vmatprep.mubr.msk.f32.mxu0 %vm6128_vm1, %v6127_v28 }
 0x579   : > { %v2385_v43 = vmul.f32 %v5886_v41, %v5874_v9  ;;  %5619 = vmatprep.subr.mxu0 %v6127_v28 }
 0x57a   : > { %v3162_v62 = vpop.permute.xlu0 %3161 }
 0x57b   : > { %5607 = vmatmul.mubr.msk.f32.vlgmr.msra.gmra.mxu1 %vm892_vm2, %v2385_v43 }
 0x57c   : > { %5615 = vmatpush3.xpose.msk.msra.mxu1 %vm892_vm2, %v2852_v23  ;;  %5616 = vmatprep.mubr.msk.f32.mxu1 %vm6128_vm1, %v6127_v28 }
 0x57d   : > { %5624 = vmatprep.subr.mxu1 %v6127_v28 }
 0x57f   : > { %5617 = vmatmul.mubr.msk.f32.vlgmr.msra.gmra.mxu1 %vm892_vm2, %v2850_v25 }
 0x580   : > { %5625 = vmatpush3.xpose.msk.msra.mxu1 %vm892_vm2, %v3008_v37  ;;  %5626 = vmatprep.mubr.msk.f32.mxu1 %vm6128_vm1, %v6127_v28 }
 0x581   : > { %5634 = vmatprep.subr.mxu1 %v6127_v28 }
 0x583   : > { %5627 = vmatmul.mubr.msk.f32.vlgmr.msra.gmra.mxu1 %vm892_vm2, %v3006_v51 }
 0x584   : > { %5635 = vmatpush3.xpose.msk.msra.mxu1 %vm892_vm2, %v3164_v60  ;;  %5636 = vmatprep.mubr.msk.f32.mxu1 %vm6128_vm1, %v6127_v28 }
 0x585   : > { %5644 = vmatprep.subr.mxu1 %v6127_v28 }
 0x587   : > { %5637 = vmatmul.mubr.msk.f32.vlgmr.msra.gmra.mxu1 %vm892_vm2, %v3162_v62 }
 0x588   : > { %5646 = vmatprep.mubr.msk.f32.mxu1 %vm6128_vm1, %v6127_v28 }
 0x5a7   : > { %v2374_v6 = vpop.xlane.xlu1 %2373 }
 0x5a8   : > { %5887 = vrcp.f32 %v2374_v6 }
 0x5ab   : > { %v3242_v9 = vpop.permute.xlu1 %3241 }
 0x5af   : > { %v3240_v11 = vpop.permute.xlu1 %3239 }
 0x5b5   : > { %v5888_v7 = vpop.eup %5887 }
 0x5b6   : > { %v2386_v8 = vmul.f32 %v5888_v7, %v6785_v19 }
 0x5b8   : > { %5612 = vmatmul.mubr.msk.f32.vlgmr.msra.gmra.mxu0 %vm892_vm2, %v2386_v8 }
 0x5b9   : > { %5620 = vmatpush3.xpose.msk.msra.mxu0 %vm892_vm2, %v6782_v15  ;;  %5621 = vmatprep.mubr.msk.f32.mxu0 %vm6128_vm1, %v6127_v28 }
 0x5ba   : > { %5629 = vmatprep.subr.mxu0 %v6127_v28 }
 0x5bc   : > { %5622 = vmatmul.mubr.msk.f32.vlgmr.msra.gmra.mxu0 %vm892_vm2, %v2928_v27 }
 0x5bd   : > { %5630 = vmatpush3.xpose.msk.msra.mxu0 %vm892_vm2, %v3086_v0  ;;  %5631 = vmatprep.mubr.msk.f32.mxu0 %vm6128_vm1, %v6127_v28 }
 0x5be   : > { %5639 = vmatprep.subr.mxu0 %v6127_v28 }
 0x5c0   : > { %5632 = vmatmul.mubr.msk.f32.vlgmr.msra.gmra.mxu0 %vm892_vm2, %v3084_v2 }
 0x5c1   : > { %5640 = vmatpush3.xpose.msk.msra.mxu0 %vm892_vm2, %v3242_v9  ;;  %5641 = vmatprep.mubr.msk.f32.mxu0 %vm6128_vm1, %v6127_v28 }
 0x5c2   : > { %5649 = vmatprep.subr.mxu0 %v6127_v28 }
 0x5c4   : > { %5642 = vmatmul.mubr.msk.f32.vlgmr.msra.gmra.mxu0 %vm892_vm2, %v3240_v11 }
 0x5c5   : > { %5651 = vmatprep.mubr.msk.f32.mxu0 %vm6128_vm1, %v6127_v28 }
 0x628   : > { %v6847_v12 = vpop.f32.mrf.mxu1 }
 0x62a   : > { %v5588_v13 = vpop.f32.mrf.mxu1 }
 0x62c   : > { %v6849_v14 = vpop.f32.mrf.mxu1 }
 0x62e   : > { %v5598_v15 = vpop.f32.mrf.mxu1 }
 0x633   : > { %v6851_v16 = vpop.f32.mrf.mxu0 }
 0x635   : > { %v5593_v17 = vpop.f32.mrf.mxu0 }
 0x637   : > { %v6853_v18 = vpop.f32.mrf.mxu0 }
 0x639   : > { %v5603_v19 = vpop.f32.mrf.mxu0 }
 0x63b   : > { %v6855_v21 = vpop.f32.mrf.mxu1 }
 0x63d   : > { %v5608_v22 = vpop.f32.mrf.mxu1 }
 0x63f   : > { %v2923_v23 = vpop.f32.mrf.mxu1 }
 0x640   : > { %v3317_v25 = vsel %vm892_vm2, %v2923_v23, -inf }
 0x641   : > { %3318 = vmax.xlane.f32.xlu0 %v3317_v25  ;;  %v5618_v26 = vpop.f32.mrf.mxu1 }
 0x643   : > { %v3079_v20 = vpop.f32.mrf.mxu1 }
 0x644   : > { %v3323_v27 = vsel %vm892_vm2, %v3079_v20, -inf }
 0x645   : > { %3324 = vmax.xlane.f32.xlu0 %v3323_v27  ;;  %v5628_v29 = vpop.f32.mrf.mxu1 }
 0x647   : > { %v3235_v57 = vpop.f32.mrf.mxu1 }
 0x648   : > { %v3329_v41 = vsel %vm892_vm2, %v3235_v57, -inf }
 0x649   : > { %v5638_v4 = vpop.f32.mrf.mxu1 }
 0x678   : > { %v6859_v30 = vpop.f32.mrf.mxu0 }
 0x67a   : > { %v5613_v31 = vpop.f32.mrf.mxu0 }
 0x67c   : > { %v3001_v32 = vpop.f32.mrf.mxu0 }
 0x67d   : > { %v3320_v33 = vsel %vm892_vm2, %v3001_v32, -inf }
 0x67e   : > { %3321 = vmax.xlane.f32.xlu1 %v3320_v33  ;;  %v5623_v34 = vpop.f32.mrf.mxu0 }
 0x680   : > { %v3157_v35 = vpop.f32.mrf.mxu0 }
 0x681   : > { %v3326_v36 = vsel %vm892_vm2, %v3157_v35, -inf }
 0x682   : > { %v5633_v37 = vpop.f32.mrf.mxu0  ;;  %3327 = vmax.xlane.f32.xlu0 %v3326_v36 }
 0x684   : > { %v6863_v38 = vpop.f32.mrf.mxu0 }
 0x685   : > { %v3332_v51 = vsel %vm892_vm2, %v6863_v38, -inf }
 0x686   : > { %v5643_v43 = vpop.f32.mrf.mxu0  ;;  %3330 = vmax.xlane.f32.xlu0 %v3329_v41 }
 0x68f   : > { %3459 = vrot.lane.b32.xlu1 %v6592_v59, %s6130_s16 }
 0x693   : > { %3535 = vrot.lane.b32.xlu1 %v6605_v1, %s6130_s16 }
 0x697   : > { %3611 = vrot.lane.b32.xlu1 %v6600_v63, %s6130_s16 }
 0x69b   : > { %3763 = vrot.lane.b32.xlu1 %v6608_v3, %s6130_s16 }
 0x69c   : > { %3383 = vrot.lane.b32.xlu0 %v6595_v61, %s6130_s16 }
 0x69f   : > { %3919 = vrot.lane.b32.xlu1 %v6529_v46, %s6131_s27 }
 0x6a0   : > { %3687 = vrot.lane.b32.xlu0 %v6665_v24, %s6130_s16  ;;  %s6053_s16 = scalar_lea.vmem %s6052_s24, 1536 }
 0x6a1   : > { %p6055_p13 = scmp.lt.s32.totalorder %s6053_s16, %s6047_s25 }
 0x6a3   : > { %p6056_p1 = por %p6055_p13, %p6054_p0 }
 0x6a4   : > { %3841 = vrot.lane.b32.xlu0 %v6517_v40, %s6131_s27 }
 0x6a5   : > { %p6057_p5 = pnand %p6056_p1, %p6050_p4 }
 0x6a8   : > { %3839 = vrot.lane.b32.xlu0 %v6526_v45, %s6131_s27 }
 0x6c3   : > { %3333 = vmax.xlane.f32.xlu1 %v3332_v51 }
 0x6ca   : > { %v3319_v60 = vpop.xlane.xlu0 %3318 }
 0x6cb   : > { %v3335_v62 = vsub.f32 %v2923_v23, %v3319_v60 }
 0x6cd   : > { %v3341_v0 = vmul.f32 1.442695, %v3335_v62 }
 0x6ce   : > { %v3325_v2 = vpop.xlane.xlu0 %3324 }
 0x6cf   : > { %5889 = vpow2.f32 %v3341_v0  ;;  %v3337_v6 = vsub.f32 %v3079_v20, %v3325_v2 }
 0x6d1   : > { %v3345_v46 = vmul.f32 1.442695, %v3337_v6 }
 0x6d3   : > { %5891 = vpow2.f32 %v3345_v46 }
 0x6d4   : > { %3917 = vrot.lane.b32.xlu1 %v6544_v50, %s6131_s27 }
 0x6dc   : > { %v5890_v7 = vpop.eup %5889 }
 0x6dd   : > { %v3353_v40 = vsel %vm892_vm2, %v5890_v7, 0.0 }
 0x6de   : > { %3354 = vadd.xlane.f32.xlu0 %v3353_v40 }
 0x6e0   : > { %v6889_v45 = vpop.eup %5891 }
 0x6e1   : > { %v3359_v8 = vsel %vm892_vm2, %v6889_v45, 0.0 }
 0x6e2   : > { %3360 = vadd.xlane.f32.xlu0 %v3359_v8 }
 0x707   : > { %v3322_v9 = vpop.xlane.xlu1 %3321 }
 0x708   : > { %v3336_v11 = vsub.f32 %v3001_v32, %v3322_v9 }
 0x70a   : > { %v3343_v13 = vmul.f32 1.442695, %v3336_v11 }
 0x70b   : > { %v3460_v15 = vpop.permute.xlu1 %3459  ;;  %v3328_v17 = vpop.xlane.xlu0 %3327 }
 0x70c   : > { %5893 = vpow2.f32 %v3343_v13  ;;  %v3338_v19 = vsub.f32 %v3157_v35, %v3328_v17  ;;  %5650 = vmatpush3.msra.mxu0 %v3460_v15 }
 0x70d   : > { %5659 = vmatprep.subr.mxu0 %v6127_v28 }
 0x70e   : > { %v3347_v50 = vmul.f32 1.442695, %v3338_v19 }
 0x70f   : > { %v3331_v22 = vpop.xlane.xlu0 %3330 }
 0x710   : > { %5895 = vpow2.f32 %v3347_v50  ;;  %v3339_v23 = vsub.f32 %v3235_v57, %v3331_v22  ;;  %v3536_v57 = vpop.permute.xlu1 %3535 }
 0x712   : > { %v3349_v25 = vmul.f32 1.442695, %v3339_v23 }
 0x713   : > { %v3384_v26 = vpop.permute.xlu0 %3383 }
 0x714   : > { %5897 = vpow2.f32 %v3349_v25  ;;  %5645 = vmatpush3.msra.mxu1 %v3384_v26  ;;  %v3612_v33 = vpop.permute.xlu1 %3611 }
 0x715   : > { %5654 = vmatprep.subr.mxu1 %v6127_v28 }
 0x717   : > { %v3688_v37 = vpop.permute.xlu0 %3687 }
 0x718   : > { %v3764_v34 = vpop.permute.xlu1 %3763 }
 0x719   : > { %v5894_v20 = vpop.eup %5893 }
 0x71a   : > { %v3356_v27 = vsel %vm892_vm2, %v5894_v20, 0.0 }
 0x71b   : > { %3357 = vadd.xlane.f32.xlu1 %v3356_v27 }
 0x71c   : > { %v6910_v35 = vpop.permute.xlu1 %3919 }
 0x71d   : > { %v5896_v29 = vpop.eup %5895 }
 0x71e   : > { %v3362_v4 = vsel %vm892_vm2, %v5896_v29, 0.0 }
 0x71f   : > { %3363 = vadd.xlane.f32.xlu1 %v3362_v4 }
 0x721   : > { %v5898_v31 = vpop.eup %5897 }
 0x722   : > { %v3365_v32 = vsel %vm892_vm2, %v5898_v31, 0.0 }
 0x723   : > { %3366 = vadd.xlane.f32.xlu0 %v3365_v32 }
 0x730   : > { %4075 = vrot.lane.b32.xlu1 %v6522_v44, %s6131_s27 }
 0x734   : > { %4073 = vrot.lane.b32.xlu1 %v6535_v48, %s6131_s27 }
 0x739   : > { %3997 = vrot.lane.b32.xlu0 %v6549_v52, %s6131_s27  ;;  %v3842_v52 = vpop.permute.xlu0 %3841 }
 0x73d   : > { %3995 = vrot.lane.b32.xlu0 %v6566_v55, %s6131_s27 }
 0x741   : > { %4153 = vrot.lane.b32.xlu0 %v6562_v54, %s6131_s27  ;;  %v3840_v54 = vpop.permute.xlu0 %3839 }
 0x745   : > { %4151 = vrot.lane.b32.xlu0 %v6579_v56, %s6131_s27 }
 0x74c   : > { %v3334_v44 = vpop.xlane.xlu1 %3333 }
 0x74d   : > { %v3340_v48 = vsub.f32 %v6863_v38, %v3334_v44 }
 0x74f   : > { %v3351_v36 = vmul.f32 1.442695, %v3340_v48 }
 0x751   : > { %5899 = vpow2.f32 %v3351_v36 }
 0x75e   : > { %v6913_v41 = vpop.eup %5899 }
 0x75f   : > { %v3368_v55 = vsel %vm892_vm2, %v6913_v41, 0.0 }
 0x760   : > { %3369 = vadd.xlane.f32.xlu1 %v3368_v55 }
 0x767   : > { %v3355_v43 = vpop.xlane.xlu0 %3354 }
 0x768   : > { %5901 = vrcp.f32 %v3355_v43 }
 0x76b   : > { %v3361_v51 = vpop.xlane.xlu0 %3360 }
 0x76c   : > { %5903 = vrcp.f32 %v3361_v51 }
 0x771   : > { %4231 = vrot.lane.b32.xlu1 %v6533_v47, %s6131_s27  ;;  %v3918_v47 = vpop.permute.xlu1 %3917 }
 0x775   : > { %v5902_v56 = vpop.eup %5901  ;;  %4229 = vrot.lane.b32.xlu1 %v6555_v53, %s6131_s27 }
 0x776   : > { %v3377_v38 = vmul.f32 %v5902_v56, %v5890_v7 }
 0x778   : > { %5647 = vmatmul.mubr.msk.f32.vlgmr.msra.gmra.mxu1 %vm892_vm2, %v3377_v38 }
 0x779   : > { %v5904_v60 = vpop.eup %5903  ;;  %5655 = vmatpush3.msra.mxu1 %v3536_v57  ;;  %5656 = vmatprep.mubr.msk.f32.mxu1 %vm6128_vm1, %v6127_v28 }
 0x77a   : > { %5664 = vmatprep.subr.mxu1 %v6127_v28  ;;  %v3379_v62 = vmul.f32 %v5904_v60, %v6889_v45 }
 0x77c   : > { %5657 = vmatmul.mubr.msk.f32.vlgmr.msra.gmra.mxu1 %vm892_vm2, %v3379_v62 }
 0x77d   : > { %5665 = vmatpush3.msra.mxu1 %v3688_v37  ;;  %5666 = vmatprep.mubr.msk.f32.mxu1 %vm6128_vm1, %v6127_v28 }
 0x77e   : > { %5674 = vmatprep.subr.mxu1 %v6127_v28 }
 0x7a4   : > { %v3358_v53 = vpop.xlane.xlu1 %3357 }
 0x7a5   : > { %5905 = vrcp.f32 %v3358_v53 }
 0x7a8   : > { %v3364_v0 = vpop.xlane.xlu1 %3363 }
 0x7a9   : > { %5907 = vrcp.f32 %v3364_v0 }
 0x7ac   : > { %v3367_v2 = vpop.xlane.xlu0 %3366  ;;  %v4076_v17 = vpop.permute.xlu1 %4075 }
 0x7ad   : > { %5909 = vrcp.f32 %v3367_v2 }
 0x7b0   : > { %v3998_v40 = vpop.permute.xlu0 %3997  ;;  %v4074_v19 = vpop.permute.xlu1 %4073 }
 0x7b2   : > { %v5906_v6 = vpop.eup %5905 }
 0x7b3   : > { %v3378_v46 = vmul.f32 %v5906_v6, %v5894_v20 }
 0x7b4   : > { %v3996_v11 = vpop.permute.xlu0 %3995 }
 0x7b5   : > { %5652 = vmatmul.mubr.msk.f32.vlgmr.msra.gmra.mxu0 %vm892_vm2, %v3378_v46 }
 0x7b6   : > { %v5908_v7 = vpop.eup %5907  ;;  %5660 = vmatpush3.msra.mxu0 %v3612_v33  ;;  %5661 = vmatprep.mubr.msk.f32.mxu0 %vm6128_vm1, %v6127_v28 }
 0x7b7   : > { %5669 = vmatprep.subr.mxu0 %v6127_v28  ;;  %v3380_v45 = vmul.f32 %v5908_v7, %v5896_v29 }
 0x7b8   : > { %v4154_v13 = vpop.permute.xlu0 %4153 }
 0x7b9   : > { %5662 = vmatmul.mubr.msk.f32.vlgmr.msra.gmra.mxu0 %vm892_vm2, %v3380_v45 }
 0x7ba   : > { %v5910_v8 = vpop.eup %5909  ;;  %5670 = vmatpush3.msra.mxu0 %v3764_v34  ;;  %5671 = vmatprep.mubr.msk.f32.mxu0 %vm6128_vm1, %v6127_v28 }
 0x7bb   : > { %v3381_v9 = vmul.f32 %v5910_v8, %v5898_v31  ;;  %5679 = vmatprep.subr.mxu0 %v6127_v28 }
 0x7bc   : > { %v4152_v15 = vpop.permute.xlu0 %4151 }
 0x7bd   : > { %5667 = vmatmul.mubr.msk.f32.vlgmr.msra.gmra.mxu1 %vm892_vm2, %v3381_v9 }
 0x7be   : > { %5675 = vmatpush3.xpose.msk.msra.mxu1 %vm892_vm2, %v3842_v52  ;;  %5676 = vmatprep.mubr.msk.f32.mxu1 %vm6128_vm1, %v6127_v28 }
 0x7bf   : > { %5684 = vmatprep.subr.mxu1 %v6127_v28 }
 0x7c1   : > { %5677 = vmatmul.mubr.msk.f32.vlgmr.msra.gmra.mxu1 %vm892_vm2, %v3840_v54 }
 0x7c2   : > { %5685 = vmatpush3.xpose.msk.msra.mxu1 %vm892_vm2, %v3998_v40  ;;  %5686 = vmatprep.mubr.msk.f32.mxu1 %vm6128_vm1, %v6127_v28 }
 0x7c3   : > { %5694 = vmatprep.subr.mxu1 %v6127_v28 }
 0x7c5   : > { %5687 = vmatmul.mubr.msk.f32.vlgmr.msra.gmra.mxu1 %vm892_vm2, %v3996_v11 }
 0x7c6   : > { %5695 = vmatpush3.xpose.msk.msra.mxu1 %vm892_vm2, %v4154_v13  ;;  %5696 = vmatprep.mubr.msk.f32.mxu1 %vm6128_vm1, %v6127_v28 }
 0x7c7   : > { %5704 = vmatprep.subr.mxu1 %v6127_v28 }
 0x7c9   : > { %5697 = vmatmul.mubr.msk.f32.vlgmr.msra.gmra.mxu1 %vm892_vm2, %v4152_v15 }
 0x7ca   : > { %5706 = vmatprep.mubr.msk.f32.mxu1 %vm6128_vm1, %v6127_v28 }
 0x7e9   : > { %v3370_v50 = vpop.xlane.xlu1 %3369 }
 0x7ea   : > { %5911 = vrcp.f32 %v3370_v50 }
 0x7ed   : > { %v4232_v25 = vpop.permute.xlu1 %4231 }
 0x7f1   : > { %v4230_v26 = vpop.permute.xlu1 %4229 }
 0x7f7   : > { %v5912_v22 = vpop.eup %5911 }
 0x7f8   : > { %v3382_v23 = vmul.f32 %v5912_v22, %v6913_v41 }
 0x7fa   : > { %5672 = vmatmul.mubr.msk.f32.vlgmr.msra.gmra.mxu0 %vm892_vm2, %v3382_v23 }
 0x7fb   : > { %5680 = vmatpush3.xpose.msk.msra.mxu0 %vm892_vm2, %v6910_v35  ;;  %5681 = vmatprep.mubr.msk.f32.mxu0 %vm6128_vm1, %v6127_v28 }
 0x7fc   : > { %5689 = vmatprep.subr.mxu0 %v6127_v28 }
 0x7fe   : > { %5682 = vmatmul.mubr.msk.f32.vlgmr.msra.gmra.mxu0 %vm892_vm2, %v3918_v47 }
 0x7ff   : > { %5690 = vmatpush3.xpose.msk.msra.mxu0 %vm892_vm2, %v4076_v17  ;;  %5691 = vmatprep.mubr.msk.f32.mxu0 %vm6128_vm1, %v6127_v28 }
 0x800   : > { %5699 = vmatprep.subr.mxu0 %v6127_v28 }
 0x802   : > { %5692 = vmatmul.mubr.msk.f32.vlgmr.msra.gmra.mxu0 %vm892_vm2, %v4074_v19 }
 0x803   : > { %5700 = vmatpush3.xpose.msk.msra.mxu0 %vm892_vm2, %v4232_v25  ;;  %5701 = vmatprep.mubr.msk.f32.mxu0 %vm6128_vm1, %v6127_v28 }
 0x804   : > { %5709 = vmatprep.subr.mxu0 %v6127_v28 }
 0x806   : > { %5702 = vmatmul.mubr.msk.f32.vlgmr.msra.gmra.mxu0 %vm892_vm2, %v4230_v26 }
 0x807   : > { %5711 = vmatprep.mubr.msk.f32.mxu0 %vm6128_vm1, %v6127_v28 }
 0x838   : > { %v6976_v20 = vpop.f32.mrf.mxu1 }
 0x83a   : > { %v5648_v27 = vpop.f32.mrf.mxu1 }
 0x83c   : > { %v6978_v29 = vpop.f32.mrf.mxu1 }
 0x83e   : > { %v5658_v4 = vpop.f32.mrf.mxu1 }
 0x875   : > { %v6980_v31 = vpop.f32.mrf.mxu0 }
 0x877   : > { %v5653_v32 = vpop.f32.mrf.mxu0 }
 0x879   : > { %v6982_v57 = vpop.f32.mrf.mxu0 }
 0x87b   : > { %v5663_v33 = vpop.f32.mrf.mxu0 }
 0x87d   : > { %v6984_v34 = vpop.f32.mrf.mxu1 }
 0x87f   : > { %v5668_v35 = vpop.f32.mrf.mxu1 }
 0x881   : > { %v3913_v44 = vpop.f32.mrf.mxu1 }
 0x882   : > { %v4307_v48 = vsel %vm892_vm2, %v3913_v44, -inf }
 0x883   : > { %4308 = vmax.xlane.f32.xlu0 %v4307_v48  ;;  %v5678_v36 = vpop.f32.mrf.mxu1 }
 0x885   : > { %v4069_v37 = vpop.f32.mrf.mxu1 }
 0x886   : > { %v4313_v52 = vsel %vm892_vm2, %v4069_v37, -inf }
 0x887   : > { %4314 = vmax.xlane.f32.xlu0 %v4313_v52  ;;  %v5688_v41 = vpop.f32.mrf.mxu1 }
 0x889   : > { %v4225_v55 = vpop.f32.mrf.mxu1 }
 0x88a   : > { %v4319_v6 = vsel %vm892_vm2, %v4225_v55, -inf }
 0x88b   : > { %v5698_v54 = vpop.f32.mrf.mxu1 }
 0x8ba   : > { %v6988_v43 = vpop.f32.mrf.mxu0 }
 0x8bc   : > { %v5673_v51 = vpop.f32.mrf.mxu0 }
 0x8be   : > { %v3991_v56 = vpop.f32.mrf.mxu0 }
 0x8bf   : > { %v4310_v38 = vsel %vm892_vm2, %v3991_v56, -inf }
 0x8c0   : > { %4311 = vmax.xlane.f32.xlu1 %v4310_v38  ;;  %v5683_v60 = vpop.f32.mrf.mxu0 }
 0x8c2   : > { %v4147_v62 = vpop.f32.mrf.mxu0 }
 0x8c3   : > { %v4316_v47 = vsel %vm892_vm2, %v4147_v62, -inf }
 0x8c4   : > { %v5693_v53 = vpop.f32.mrf.mxu0  ;;  %4317 = vmax.xlane.f32.xlu0 %v4316_v47 }
 0x8c6   : > { %v4303_v0 = vpop.f32.mrf.mxu0 }
 0x8c7   : > { %v4322_v2 = vsel %vm892_vm2, %v4303_v0, -inf }
 0x8c8   : > { %4323 = vmax.xlane.f32.xlu1 %v4322_v2  ;;  %v5703_v46 = vpop.f32.mrf.mxu0  ;;  %4320 = vmax.xlane.f32.xlu0 %v4319_v6 }
 0x8d9   : > { %4449 = vrot.lane.b32.xlu1 %v6592_v59, %s6131_s27 }
 0x8dd   : > { %4525 = vrot.lane.b32.xlu1 %v6605_v1, %s6131_s27 }
 0x8de   : > { %4373 = vrot.lane.b32.xlu0 %v6595_v61, %s6131_s27 }
 0x8e1   : > { %4601 = vrot.lane.b32.xlu1 %v6600_v63, %s6131_s27 }
 0x90c   : > { %v4309_v7 = vpop.xlane.xlu0 %4308 }
 0x90d   : > { %v4325_v40 = vsub.f32 %v3913_v44, %v4309_v7 }
 0x90f   : > { %v4331_v45 = vmul.f32 1.442695, %v4325_v40 }
 0x910   : > { %v4315_v8 = vpop.xlane.xlu0 %4314 }
 0x911   : > { %5913 = vpow2.f32 %v4331_v45  ;;  %v4327_v9 = vsub.f32 %v4069_v37, %v4315_v8 }
 0x913   : > { %v4335_v11 = vmul.f32 1.442695, %v4327_v9 }
 0x915   : > { %5915 = vpow2.f32 %v4335_v11 }
 0x91e   : > { %v5914_v13 = vpop.eup %5913 }
 0x91f   : > { %v4343_v59 = vsel %vm892_vm2, %v5914_v13, 0.0 }
 0x920   : > { %4344 = vadd.xlane.f32.xlu0 %v4343_v59  ;;  %v4923_v59 = vld [vmem:[#allocation8 + $0x10] sm:$0xff] }
 0x922   : > { %v7003_v15 = vpop.eup %5915 }
 0x923   : > { %v4349_v61 = vsel %vm892_vm2, %v7003_v15, 0.0 }
 0x924   : > { %4350 = vadd.xlane.f32.xlu0 %v4349_v61 }
 0x949   : > { %v4312_v1 = vpop.xlane.xlu1 %4311 }
 0x94a   : > { %v4326_v63 = vsub.f32 %v3991_v56, %v4312_v1 }
 0x94c   : > { %v4333_v17 = vmul.f32 1.442695, %v4326_v63  ;;  %v4921_v63 = vld [vmem:[#allocation8] sm:$0xff] }
 0x94d   : > { %v4318_v19 = vpop.xlane.xlu0 %4317 }
 0x94e   : > { %5917 = vpow2.f32 %v4333_v17  ;;  %v4328_v50 = vsub.f32 %v4147_v62, %v4318_v19 }
 0x950   : > { %v4337_v22 = vmul.f32 1.442695, %v4328_v50 }
 0x951   : > { %v4324_v23 = vpop.xlane.xlu1 %4323  ;;  %v4321_v25 = vpop.xlane.xlu0 %4320 }
 0x952   : > { %5919 = vpow2.f32 %v4337_v22  ;;  %v4330_v26 = vsub.f32 %v4303_v0, %v4324_v23  ;;  %v4329_v27 = vsub.f32 %v4225_v55, %v4321_v25 }
 0x954   : > { %v4341_v4 = vmul.f32 1.442695, %v4330_v26  ;;  %v4339_v32 = vmul.f32 1.442695, %v4329_v27 }
 0x955   : > { %v4450_v33 = vpop.permute.xlu1 %4449  ;;  %v4374_v35 = vpop.permute.xlu0 %4373 }
 0x956   : > { %5921 = vpow2.f32 %v4341_v4  ;;  %5705 = vmatpush3.msra.mxu1 %v4374_v35  ;;  %5710 = vmatpush3.msra.mxu0 %v4450_v33 }
 0x957   : > { %5923 = vpow2.f32 %v4339_v32  ;;  %5714 = vmatprep.subr.mxu1 %v6127_v28  ;;  %5719 = vmatprep.subr.mxu0 %v6127_v28 }
 0x95b   : > { %v5918_v44 = vpop.eup %5917 }
 0x95c   : > { %v4346_v48 = vsel %vm892_vm2, %v5918_v44, 0.0 }
 0x95d   : > { %4347 = vadd.xlane.f32.xlu1 %v4346_v48 }
 0x95f   : > { %v5920_v36 = vpop.eup %5919 }
 0x960   : > { %v4352_v37 = vsel %vm892_vm2, %v5920_v36, 0.0 }
 0x961   : > { %4353 = vadd.xlane.f32.xlu1 %v4352_v37 }
 0x963   : > { %v7011_v52 = vpop.eup %5921 }
 0x964   : > { %v7013_v41 = vpop.eup %5923  ;;  %v4358_v55 = vsel %vm892_vm2, %v7011_v52, 0.0 }
 0x965   : > { %4359 = vadd.xlane.f32.xlu1 %v4358_v55  ;;  %v4355_v54 = vsel %vm892_vm2, %v7013_v41, 0.0 }
 0x966   : > { %4356 = vadd.xlane.f32.xlu0 %v4355_v54 }
 0x976   : > { %4753 = vrot.lane.b32.xlu1 %v6608_v3, %s6131_s27 }
 0x97a   : > { %4837 = vrot.lane.b32.xlu1 %v6851_v16, %s6132_s1 }
 0x97c   : > { %4677 = vrot.lane.b32.xlu0 %v6665_v24, %s6131_s27 }
 0x97e   : > { %4861 = vrot.lane.b32.xlu1 %v6980_v31, %s6133_s29 }
 0x980   : > { %4835 = vrot.lane.b32.xlu0 %v6847_v12, %s6132_s1 }
 0x982   : > { %4841 = vrot.lane.b32.xlu1 %v6853_v18, %s6132_s1  ;;  %v4526_v18 = vpop.permute.xlu1 %4525 }
 0x984   : > { %4859 = vrot.lane.b32.xlu0 %v6976_v20, %s6133_s29 }
 0x986   : > { %4865 = vrot.lane.b32.xlu1 %v6982_v57, %s6133_s29 }
 0x988   : > { %4839 = vrot.lane.b32.xlu0 %v6849_v14, %s6132_s1 }
 0x98a   : > { %4845 = vrot.lane.b32.xlu1 %v6859_v30, %s6132_s1 }
 0x98c   : > { %4863 = vrot.lane.b32.xlu0 %v6978_v29, %s6133_s29 }
 0x98e   : > { %4869 = vrot.lane.b32.xlu1 %v6988_v43, %s6133_s29 }
 0x990   : > { %4843 = vrot.lane.b32.xlu0 %v6855_v21, %s6132_s1  ;;  %v4602_v21 = vpop.permute.xlu1 %4601 }
 0x994   : > { %4867 = vrot.lane.b32.xlu0 %v6984_v34, %s6133_s29 }
 0x9a9   : > { %v4345_v3 = vpop.xlane.xlu0 %4344 }
 0x9aa   : > { %5925 = vrcp.f32 %v4345_v3 }
 0x9ad   : > { %v4351_v24 = vpop.xlane.xlu0 %4350 }
 0x9ae   : > { %5927 = vrcp.f32 %v4351_v24 }
 0x9b7   : > { %v5926_v12 = vpop.eup %5925 }
 0x9b8   : > { %v4367_v16 = vmul.f32 %v5926_v12, %v5914_v13  ;;  %v4924_v13 = vld [vmem:[#allocation8 + $0x18] sm:$0xff] }
 0x9ba   : > { %5707 = vmatmul.mubr.msk.f32.vlgmr.msra.gmra.mxu1 %vm892_vm2, %v4367_v16 }
 0x9bb   : > { %v5928_v14 = vpop.eup %5927  ;;  %5715 = vmatpush3.msra.mxu1 %v4526_v18  ;;  %5716 = vmatprep.mubr.msk.f32.mxu1 %vm6128_vm1, %v6127_v28 }
 0x9bc   : > { %v4369_v30 = vmul.f32 %v5928_v14, %v7003_v15  ;;  %5724 = vmatprep.subr.mxu1 %v6127_v28  ;;  %v4922_v15 = vld [vmem:[#allocation8 + $0x8] sm:$0xff] }
 0x9be   : > { %5717 = vmatmul.mubr.msk.f32.vlgmr.msra.gmra.mxu1 %vm892_vm2, %v4369_v30 }
 0x9bf   : > { %5726 = vmatprep.mubr.msk.f32.mxu1 %vm6128_vm1, %v6127_v28 }
 0x9e6   : > { %v4348_v20 = vpop.xlane.xlu1 %4347 }
 0x9e7   : > { %5929 = vrcp.f32 %v4348_v20 }
 0x9ea   : > { %v4354_v29 = vpop.xlane.xlu1 %4353 }
 0x9eb   : > { %5931 = vrcp.f32 %v4354_v29 }
 0x9ee   : > { %v4360_v31 = vpop.xlane.xlu1 %4359 }
 0x9ef   : > { %5933 = vrcp.f32 %v4360_v31  ;;  %v4357_v57 = vpop.xlane.xlu0 %4356 }
 0x9f0   : > { %5935 = vrcp.f32 %v4357_v57  ;;  %v5293_v57 = vld [vmem:[%s7212_s14] ss:$0 sm:$0xff] }
 0x9f2   : > { %v4754_v62 = vpop.permute.xlu1 %4753 }
 0x9f3   : > { %v4678_v34 = vpop.permute.xlu0 %4677 }
 0x9f4   : > { %v5930_v43 = vpop.eup %5929  ;;  %5725 = vmatpush3.msra.mxu1 %v4678_v34 }
 0x9f5   : > { %v4368_v51 = vmul.f32 %v5930_v43, %v5918_v44  ;;  %5734 = vmatprep.subr.mxu1 %v4924_v13 }
 0x9f6   : > { %v4838_v44 = vpop.permute.xlu1 %4837 }
 0x9f7   : > { %v4836_v56 = vpop.permute.xlu0 %4835  ;;  %5712 = vmatmul.mubr.msk.f32.vlgmr.msra.gmra.mxu0 %vm892_vm2, %v4368_v51  ;;  %v4902_v55 = vsel %vm892_vm2, %v6728_v58, %v4838_v44 }
 0x9f8   : > { %v5932_v38 = vpop.eup %5931  ;;  %5720 = vmatpush3.msra.mxu0 %v4602_v21  ;;  %5721 = vmatprep.mubr.msk.f32.mxu0 %vm6128_vm1, %v6127_v28  ;;  %v4901_v4 = vsel %vm892_vm2, %v6722_v39, %v4836_v56 }
 0x9f9   : > { %5729 = vmatprep.subr.mxu0 %v6127_v28  ;;  %v4370_v60 = vmul.f32 %v5932_v38, %v5920_v36 }
 0x9fa   : > { %v4862_v48 = vpop.permute.xlu1 %4861 }
 0x9fb   : > { %v4860_v47 = vpop.permute.xlu0 %4859  ;;  %5722 = vmatmul.mubr.msk.f32.vlgmr.msra.gmra.mxu0 %vm892_vm2, %v4370_v60  ;;  %v4909_v3 = vsel %vm4907_vm3, %v4902_v55, %v4862_v48 }
 0x9fc   : > { %v5934_v53 = vpop.eup %5933  ;;  %5730 = vmatpush3.msra.mxu0 %v4754_v62  ;;  %5731 = vmatprep.mubr.msk.f32.mxu0 %vm6128_vm1, %v6127_v28  ;;  %v4908_v32 = vsel %vm4907_vm3, %v4901_v4, %v4860_v47 }
 0x9fd   : > { %v5936_v0 = vpop.eup %5935  ;;  %v4372_v2 = vmul.f32 %v5934_v53, %v7011_v52 }
 0x9fe   : > { %v4371_v6 = vmul.f32 %v5936_v0, %v7013_v41  ;;  %v4842_v36 = vpop.permute.xlu1 %4841 }
 0x9ff   : > { %v4840_v46 = vpop.permute.xlu0 %4839  ;;  %5732 = vmatmul.mubr.msk.f32.vlgmr.msra.gmra.mxu0 %vm892_vm2, %v4372_v2  ;;  %v4904_v16 = vsel %vm892_vm2, %v6731_v5, %v4842_v36 }
 0xa00   : > { %5727 = vmatmul.mubr.msk.f32.vlgmr.msra.gmra.mxu1 %vm892_vm2, %v4371_v6  ;;  %v4903_v7 = vsel %vm892_vm2, %v6724_v42, %v4840_v46 }
 0xa01   : > { %5735 = vmatpush3.msra.mxu1 %v4924_v13 }
 0xa02   : > { %5736 = vmatprep.subr.mxu1 %v4923_v59  ;;  %v4866_v37 = vpop.permute.xlu1 %4865 }
 0xa03   : > { %v4864_v40 = vpop.permute.xlu0 %4863  ;;  %5737 = vmatpush3.msra.mxu1 %v4923_v59  ;;  %v4911_v18 = vsel %vm4907_vm3, %v4904_v16, %v4866_v37 }
 0xa04   : > { %v4910_v45 = vsel %vm4907_vm3, %v4903_v7, %v4864_v40  ;;  %5738 = vmatprep.subr.mxu1 %v4922_v15 }
 0xa05   : > { %5739 = vmatpush3.msra.mxu1 %v4922_v15 }
 0xa06   : > { %5740 = vmatprep.subr.mxu1 %v4921_v63  ;;  %v4846_v52 = vpop.permute.xlu1 %4845 }
 0xa07   : > { %v4844_v8 = vpop.permute.xlu0 %4843  ;;  %5741 = vmatpush3.msra.mxu1 %v4921_v63  ;;  %v4906_v30 = vsel %vm892_vm2, %v6734_v10, %v4846_v52 }
 0xa08   : > { %v4905_v28 = vsel %vm892_vm2, %v6726_v49, %v4844_v8 }
 0xa0a   : > { %v4870_v41 = vpop.permute.xlu1 %4869 }
 0xa0b   : > { %v4868_v9 = vpop.permute.xlu0 %4867  ;;  %v4913_v21 = vsel %vm4907_vm3, %v4906_v30, %v4870_v41 }
 0xa0c   : > { %v7066_v11 = vsel %vm4907_vm3, %v4905_v28, %v4868_v9 }
 0xa7a   : > { %v4445_v42 = vpop.f32.mrf.mxu1 }
 0xa7b   : > { %4883 = vrot.lane.b32.xlu0 %v4445_v42, %s6134_s21 }
 0xa7c   : > { %v5708_v61 = vpop.f32.mrf.mxu1 }
 0xa7e   : > { %v4597_v1 = vpop.f32.mrf.mxu1 }
 0xa7f   : > { %4887 = vrot.lane.b32.xlu0 %v4597_v1, %s6134_s21 }
 0xa80   : > { %v5718_v49 = vpop.f32.mrf.mxu1 }
 0xab7   : > { %v4521_v17 = vpop.f32.mrf.mxu0 }
 0xab8   : > { %4885 = vrot.lane.b32.xlu1 %v4521_v17, %s6134_s21 }
 0xab9   : > { %v5713_v19 = vpop.f32.mrf.mxu0 }
 0xabb   : > { %v4673_v50 = vpop.f32.mrf.mxu0 }
 0xabc   : > { %4889 = vrot.lane.b32.xlu1 %v4673_v50, %s6134_s21 }
 0xabd   : > { %v5723_v22 = vpop.f32.mrf.mxu0 }
 0xabf   : > { %v4825_v23 = vpop.f32.mrf.mxu0 }
 0xac0   : > { %v4749_v25 = vpop.f32.mrf.mxu1  ;;  %4893 = vrot.lane.b32.xlu1 %v4825_v23, %s6134_s21 }
 0xac1   : > { %4891 = vrot.lane.b32.xlu0 %v4749_v25, %s6134_s21  ;;  %v5733_v26 = vpop.f32.mrf.mxu0 }
 0xac2   : > { %v5728_v27 = vpop.f32.mrf.mxu1 }
 0xaed   : > { %v4884_v33 = vpop.permute.xlu0 %4883 }
 0xaee   : > { %v4915_v35 = vsel %vm4914_vm4, %v4908_v32, %v4884_v33 }
 0xaef   : > { %5742 = vmatprep.mubr.msk.f32.mxu1 %vm518_vm0, %v4915_v35 }
 0xaf1   : > { %v4888_v54 = vpop.permute.xlu0 %4887 }
 0xaf2   : > { %v4917_v12 = vsel %vm4914_vm4, %v4910_v45, %v4888_v54 }
 0xb2a   : > { %v4886_v39 = vpop.permute.xlu1 %4885 }
 0xb2b   : > { %v4916_v24 = vsel %vm4914_vm4, %v4909_v3, %v4886_v39 }
 0xb2c   : > { %5743 = vmatmul.mubr.msk.f32.vlgmr.msra.gmra.mxu1 %vm518_vm0, %v4916_v24 }
 0xb2d   : > { %5745 = vmatprep.mubr.msk.f32.mxu1 %vm518_vm0, %v4917_v12 }
 0xb2e   : > { %v4890_v14 = vpop.permute.xlu1 %4889 }
 0xb2f   : > { %v4918_v58 = vsel %vm4914_vm4, %v4911_v18, %v4890_v14 }
 0xb30   : > { %5746 = vmatmul.mubr.msk.f32.gmra.mxu1 %vm518_vm0, %v4918_v58 }
 0xb32   : > { %v4894_v20 = vpop.permute.xlu1 %4893 }
 0xb33   : > { %v4920_v29 = vsel %vm4914_vm4, %v4913_v21, %v4894_v20  ;;  %v4892_v31 = vpop.permute.xlu0 %4891 }
 0xb34   : > { %v4919_v5 = vsel %vm4914_vm4, %v7066_v11, %v4892_v31 }
 0xb35   : > { %5748 = vmatprep.mubr.msk.f32.mxu1 %vm518_vm0, %v4919_v5 }
 0xb36   : > { %5749 = vmatmul.mubr.msk.f32.gmra.mxu1 %vm518_vm0, %v4920_v29 }
 0xbec   : > { %v5744_v34 = vpop.f32.mrf.mxu1 }
 0xbed   : > { %v5022_v10 = vadd.f32 %v5744_v34, %v5293_v57 }
 0xbee   : > { %v5016_v43 = vpop.f32.mrf.mxu1 }
 0xbef   : > { %5046 = vst.msk [vmem:[%s496_s19 + $0x8] sm:$0xff] %vm518_vm0, %v5022_v10  ;;  %v5017_v51 = vadd.f32 %v5293_v57, %v5016_v43 }
 0xbf0   : > { %v5747_v56 = vpop.f32.mrf.mxu1 }
 0xbf1   : > { %5045 = vst.msk [vmem:[%s496_s19] sm:$0xff] %vm518_vm0, %v5017_v51  ;;  %v5032_v38 = vadd.f32 %v5747_v56, %v5293_v57 }
 0xbf2   : > { %v5026_v60 = vpop.f32.mrf.mxu1 }
 0xbf3   : > { %5048 = vst.msk [vmem:[%s496_s19 + $0x18] sm:$0xff] %vm518_vm0, %v5032_v38  ;;  %v5027_v62 = vadd.f32 %v5293_v57, %v5026_v60 }
 0xbf5   : > { %5047 = vst.msk [vmem:[%s496_s19 + $0x10] sm:$0xff] %vm518_vm0, %v5027_v62 }
 0xbf6   : > { %v5750_v47 = vpop.f32.mrf.mxu1 }
 0xbf7   : > { %v5042_v53 = vadd.f32 %v5750_v47, %v5293_v57 }
 0xbf8   : > { %v5036_v0 = vpop.f32.mrf.mxu1 }
 0xbf9   : > { %5050 = vst.msk [vmem:[%s496_s19 + $0x28] sm:$0xff] %vm518_vm0, %v5042_v53  ;;  %v5037_v2 = vadd.f32 %v5293_v57, %v5036_v0 }
 0xbfb   : > { %5049 = vst.msk [vmem:[%s496_s19 + $0x20] sm:$0xff] %vm518_vm0, %v5037_v2 }
 0xbfc   : > { %6060 = shalt.err (!%p6057_p5)
}
 0xbfd   : > { %s6061_s27 = scalar_lea.hbm %s7108_s12, 768  ;;  %s6065_s15 = scalar_lea.hbm %s7214_s11, 1536 }
 0xbfe   : > { %p6062_p9 = scmp.ne.s32.totalorder %s7108_s12, %s6061_s27  ;;  %p6066_p11 = scmp.lt.s32.totalorder %s7108_s12, %s7214_s11 }
 0xbff   : > { %p6067_p6 = scmp.lt.s32.totalorder %s6065_s15, %s6061_s27 }
 0xc00   : > { %p6063_p10 = pnand %p6062_p9, %p7215_p3 }
 0xc01   : > { %p6068_p12 = por %p6067_p6, %p6066_p11 }
 0xc02   : > { %p6064_p8 = pneg %p6063_p10 }
 0xc04   : > { %p6069_p2 = pnand %p6068_p12, %p6064_p8 }
 0xc06   : > { %6072 = shalt.err (!%p6069_p2)
}
 0xc07   : > { %s6136_s19 = smov 128  }
 0xc08   : > { %5773 = dma.vmem_to_hbm [thread:$0]  (%p7215_p3), %s7102_s13, 768, %s7108_s12, %s5052_s17, %s6136_s19, %s6136_s19, %s6132_s1  }
 0xc09 PF: > { %s7216_s30 = sld [smem:[#allocation15_spill]] }
 0xc0a   : > { %s7217_s28 = sld [smem:[#allocation21_spill]] }
 0xc0b   : > { %s7218_s26 = sld [smem:[#allocation17_spill]] }
 0xc0f   : > { %s5080_s25 = sand.u32 1, %s7216_s30  }
 0xc10   : > { %p7219_p7 = scmp.ne.s32.totalorder %s7217_s28, 0  ;;  %s5081_s20 = scalar_lea.sflag [#allocation4], %s5080_s25 }
 0xc11   : > { %p7220_p4 = scmp.ge.s32.totalorder %s7218_s26, 2 }
 0xc13   : > { %p5790_p0 = pnand %p7220_p4, %p7219_p7 }
 0xc15   : > { %p5791_p13 = pneg %p5790_p0 }
 0xc17   : > { %6102 = dma.done.wait (%p5791_p13), %s5081_s20, 768  }
 0xc18   : > { %6104 = vsyncadd (%p5791_p13), %s5081_s20, 4294966528  ;;  %s7221_s20 = sld [smem:[#allocation18_spill]]  ;;  %s7224_s17 = smov %s6111_s18 }
 0xc19   : > { %s7222_s10 = sld [smem:[#allocation16_spill]] }
 0xc1a   : > { %s7223_s19 = sld [smem:[#allocation19_spill]] }
 0xc1e   : > { %p28_p1 = scmp.ge.s32.totalorder %s7221_s20, 4  }
 0xc1f   : > { %s7225_s18 = smov %s7222_s10 }
 0xc20   :  { %30 = sbr.rel (!%p28_p1) target bundleno = 12 (0xc), region = 137 }
 0xc25   :  { %5086 = vsyncpa [#allocation3], 1 }
 0xc26   :  { %5088 = vsyncpa [#allocation3 + $0x1], 1 }
 0xc27   :  { %5089 = vsyncpa [#allocation6], 1 }
 0xc28   :  { %5091 = vsyncpa [#allocation6 + $0x1], 1 }
 0xc29   :  { %5092 = vsyncpa [#allocation9], 1 }
 0xc2a   :  { %5093 = vsyncpa [#allocation4], 1 }
 0xc2b   :  { %5095 = vsyncpa [#allocation4 + $0x1], 1 }

</bundles_post_ra>
